<compile_context>
chip_gen: v5e
topology: v5e:2x2
jax: 0.10.0
libtpu: 0.0.40
codegen_flags: <defaults>
</compile_context>

<pallas_src>
import jax
import jax.numpy as jnp
from jax.experimental import pallas as pl
from jax.experimental.pallas import tpu as pltpu

KERNEL_SIZE = 3
NUM_INPUTS = 16
NUM_CHANNELS = [32, 64, 128]


def _round_up(x, m):
    return ((x + m - 1) // m) * m


def _make_tcn_kernel(layer_cfgs, *, L, K, Nb):
    """Fused kernel: the whole TCN stack for one (Nb, L, Cin) batch tile."""
    num_layers = len(layer_cfgs)

    def kernel(*refs):
        x_ref = refs[0]
        w_refs = refs[1:1 + 6 * num_layers]
        o_ref = refs[1 + 6 * num_layers]
        scratch = refs[2 + 6 * num_layers:]

        # Current layer input: rows = batch*time, channels on the lane dim.
        x_cur = x_ref[...].reshape(Nb * L, layer_cfgs[0]["cin"])   # f32

        for i, cfg in enumerate(layer_cfgs):
            cin, cout, d = cfg["cin"], cfg["cout"], cfg["dilation"]
            pad = (K - 1) * d
            pa = _round_up(pad, 8)      # sublane-aligned causal pad region
            off = pa - pad              # first tap starts here
            w1, b1, w2, b2, wd, bd = w_refs[6 * i:6 * i + 6]
            xp, hp = scratch[2 * i], scratch[2 * i + 1]

            # ---- causal left-pad of the layer input (stays in VMEM) ----
            xp[:, :pa, :] = jnp.zeros((Nb, pa, cin), jnp.float32)
            xp[:, pa:, :] = x_cur.reshape(Nb, L, cin)

            # ---- conv1: im2col over the K dilated taps -> one MXU matmul ----
            slab1 = jnp.concatenate(
                [xp[:, off + k * d: off + k * d + L, :] for k in range(K)],
                axis=-1).reshape(Nb * L, K * cin)
            h = jnp.dot(slab1.astype(jnp.bfloat16), w1[...],
                        preferred_element_type=jnp.float32)
            h = jnp.maximum(h + b1[...], 0.0)
            # TODO(synk): dropout1 treated as identity (eval-mode semantics).

            # ---- causal left-pad of the hidden activation ----
            hp[:, :pa, :] = jnp.zeros((Nb, pa, cout), jnp.float32)
            hp[:, pa:, :] = h.reshape(Nb, L, cout)

            # ---- conv2: im2col -> one MXU matmul ----
            slab2 = jnp.concatenate(
                [hp[:, off + k * d: off + k * d + L, :] for k in range(K)],
                axis=-1).reshape(Nb * L, K * cout)
            out = jnp.dot(slab2.astype(jnp.bfloat16), w2[...],
                          preferred_element_type=jnp.float32)
            out = jnp.maximum(out + b2[...], 0.0)
            # TODO(synk): dropout2 treated as identity (eval-mode semantics).

            # ---- residual 1x1 conv (Cin != Cout at every level here) ----
            res = jnp.dot(x_cur.astype(jnp.bfloat16), wd[...],
                          preferred_element_type=jnp.float32) + bd[...]

            x_cur = jnp.maximum(out + res, 0.0)     # (Nb*L, cout) f32

        o_ref[...] = x_cur.reshape(Nb, L, layer_cfgs[-1]["cout"]).astype(
            o_ref.dtype)

    return kernel


def _pick_block_batch(N, L):
    """Batch rows per grid step: aim for Nb*L >= 256 (MXU M fill) while
    keeping >= 2 parallel grid blocks (v7x: 2 TensorCores/chip)."""
    if N <= 1:
        return 1
    nb = max(1, min(N // 2, max(1, 256 // max(L, 1))))
    while N % nb:
        nb -= 1
    return nb


def tcn_forward(x_ncl, params, *, kernel_size=KERNEL_SIZE):
    """x_ncl: (N, C_in, L) float32 (PyTorch Conv1d layout) -> (N, C_out, L)."""
    N, cin0, L = x_ncl.shape
    K = kernel_size
    num_layers = len(params)
    couts = [int(p["b1"].shape[-1]) for p in params]
    cins = [cin0] + couts[:-1]
    layer_cfgs = [dict(cin=cins[i], cout=couts[i], dilation=2 ** i)
                  for i in range(num_layers)]

    Nb = _pick_block_batch(N, L)
    grid = N // Nb

    # NCL -> NLC: time on sublanes, channels on lanes (lane-dense output).
    x_nlc = jnp.transpose(x_ncl, (0, 2, 1)).astype(jnp.float32)

    in_specs = [pl.BlockSpec((Nb, L, cin0), lambda n: (n, 0, 0))]
    operands = [x_nlc]
    for p in params:
        for name in ("w1", "b1", "w2", "b2", "wd", "bd"):
            arr = p[name]
            in_specs.append(pl.BlockSpec(arr.shape, lambda n: (0, 0)))
            operands.append(arr)

    scratch_shapes = []
    for cfg in layer_cfgs:
        pa = _round_up((K - 1) * cfg["dilation"], 8)
        scratch_shapes.append(pltpu.VMEM((Nb, pa + L, cfg["cin"]), jnp.float32))
        scratch_shapes.append(pltpu.VMEM((Nb, pa + L, cfg["cout"]), jnp.float32))

    kernel = _make_tcn_kernel(layer_cfgs, L=L, K=K, Nb=Nb)

    out_nlc = pl.pallas_call(
        kernel,
        out_shape=jax.ShapeDtypeStruct((N, L, couts[-1]), jnp.float32),
        grid_spec=pltpu.PrefetchScalarGridSpec(
            num_scalar_prefetch=0,
            grid=(grid,),
            in_specs=in_specs,
            out_specs=pl.BlockSpec((Nb, L, couts[-1]), lambda n: (n, 0, 0)),
            scratch_shapes=scratch_shapes,
        ),
        compiler_params=pltpu.CompilerParams(
            dimension_semantics=("parallel",)),
    )(*operands)

    return jnp.transpose(out_nlc, (0, 2, 1))   # NLC -> NCL


def init_tcn_params(key, num_inputs, num_channels, kernel_size):
    """Deterministic synthetic init mirroring the PyTorch module's shapes.

    Conv weights are stored pre-reshaped to the im2col layout (K*Cin, Cout)
    and pre-cast to bf16 (MXU-native operand dtype); biases stay f32.
    """
    params = []
    cin = num_inputs
    for cout in num_channels:
        key, k1, k2, k3, k4, k5, k6 = jax.random.split(key, 7)

        def weight_normed(k, co, ci, ks):
            v = 0.01 * jax.random.normal(k, (co, ci, ks), jnp.float32)
            g = jnp.sqrt(jnp.sum(v * v, axis=(1, 2), keepdims=True))  # g=||v||
            return g * v / jnp.maximum(g, 1e-12)                      # == v

        def to_im2col(w_pt):
            # (Cout, Cin, K) -> (K*Cin, Cout); matches the kernel's tap-major
            # channel concatenation order.
            co, ci, ks = w_pt.shape
            return jnp.transpose(w_pt, (2, 1, 0)).reshape(ks * ci, co)

        w1_pt = weight_normed(k1, cout, cin, kernel_size)
        b1 = 0.01 * jax.random.normal(k2, (cout,), jnp.float32)
        w2_pt = weight_normed(k3, cout, cout, kernel_size)
        b2 = 0.01 * jax.random.normal(k4, (cout,), jnp.float32)
        wd_pt = 0.01 * jax.random.normal(k5, (cout, cin, 1), jnp.float32)
        bd = 0.01 * jax.random.normal(k6, (cout,), jnp.float32)

        params.append(dict(
            w1=to_im2col(w1_pt).astype(jnp.bfloat16),              # (K*Cin, Cout)
            b1=b1[None, :],                                        # (1, Cout) f32
            w2=to_im2col(w2_pt).astype(jnp.bfloat16),              # (K*Cout, Cout)
            b2=b2[None, :],
            wd=jnp.transpose(wd_pt[:, :, 0]).astype(jnp.bfloat16),  # (Cin, Cout)
            bd=bd[None, :],
        ))
        cin = cout
    return params


# ---- pure-JAX f32 reference (correctness sanity check) ---------------------
def _causal_conv_ref(x_nlc, w_im2col, b, dilation, K):
    N, L, _ = x_nlc.shape
    pad = (K - 1) * dilation
    xp = jnp.pad(x_nlc, ((0, 0), (pad, 0), (0, 0)))
    slab = jnp.concatenate(
        [xp[:, k * dilation:k * dilation + L, :] for k in range(K)], axis=-1)
    return jnp.einsum("nlc,cd->nld", slab,
                      w_im2col.astype(jnp.float32)) + b[None]


def tcn_reference(x_ncl, params, kernel_size=KERNEL_SIZE):
    x = jnp.transpose(x_ncl, (0, 2, 1)).astype(jnp.float32)
    for i, p in enumerate(params):
        d = 2 ** i
        h = jnp.maximum(_causal_conv_ref(x, p["w1"], p["b1"], d, kernel_size), 0.0)
        o = jnp.maximum(_causal_conv_ref(h, p["w2"], p["b2"], d, kernel_size), 0.0)
        res = jnp.einsum("nlc,cd->nld", x,
                         p["wd"].astype(jnp.float32)) + p["bd"][None]
        x = jnp.maximum(o + res, 0.0)
    return jnp.transpose(x, (0, 2, 1))


if __name__ == "__main__":
    key = jax.random.PRNGKey(0)
    key_x, key_p = jax.random.split(key)

    N, L = 2, 32
    x = jax.random.normal(key_x, (N, NUM_INPUTS, L), jnp.float32)  # [N, C, L]

    params = init_tcn_params(key_p, NUM_INPUTS, NUM_CHANNELS, KERNEL_SIZE)

    out = jax.block_until_ready(tcn_forward(x, params))
    assert out.shape == (N, NUM_CHANNELS[-1], L), out.shape

    ref = jax.block_until_ready(tcn_reference(x, params))
    # bf16 MXU operands (f32 accumulation) => loosened tolerance vs f32 ref.
    assert jnp.allclose(out, ref, rtol=2e-2, atol=1e-3), \
        float(jnp.max(jnp.abs(out - ref)))

    print("KERNEL_OK")
</pallas_src>

<mosaic_0001>
module attributes {stable_mosaic.version = 11 : i64} {
  func.func @kernel(%arg0: i32, %arg1: memref<1x32x16xf32, #tpu.memory_space<vmem>>, %arg2: memref<48x32xbf16, #tpu.memory_space<vmem>>, %arg3: memref<1x32xf32, #tpu.memory_space<vmem>>, %arg4: memref<96x32xbf16, #tpu.memory_space<vmem>>, %arg5: memref<1x32xf32, #tpu.memory_space<vmem>>, %arg6: memref<16x32xbf16, #tpu.memory_space<vmem>>, %arg7: memref<1x32xf32, #tpu.memory_space<vmem>>, %arg8: memref<96x64xbf16, #tpu.memory_space<vmem>>, %arg9: memref<1x64xf32, #tpu.memory_space<vmem>>, %arg10: memref<192x64xbf16, #tpu.memory_space<vmem>>, %arg11: memref<1x64xf32, #tpu.memory_space<vmem>>, %arg12: memref<32x64xbf16, #tpu.memory_space<vmem>>, %arg13: memref<1x64xf32, #tpu.memory_space<vmem>>, %arg14: memref<192x128xbf16, #tpu.memory_space<vmem>>, %arg15: memref<1x128xf32, #tpu.memory_space<vmem>>, %arg16: memref<384x128xbf16, #tpu.memory_space<vmem>>, %arg17: memref<1x128xf32, #tpu.memory_space<vmem>>, %arg18: memref<64x128xbf16, #tpu.memory_space<vmem>>, %arg19: memref<1x128xf32, #tpu.memory_space<vmem>>, %arg20: memref<1x32x128xf32, #tpu.memory_space<vmem>>, %arg21: memref<1x40x16xf32, #tpu.memory_space<vmem>>, %arg22: memref<1x40x32xf32, #tpu.memory_space<vmem>>, %arg23: memref<1x40x32xf32, #tpu.memory_space<vmem>>, %arg24: memref<1x40x64xf32, #tpu.memory_space<vmem>>, %arg25: memref<1x40x64xf32, #tpu.memory_space<vmem>>, %arg26: memref<1x40x128xf32, #tpu.memory_space<vmem>>) attributes {dimension_semantics = [#tpu.dimension_semantics<parallel>], iteration_bounds = array<i64: 2>, scalar_prefetch = 0 : i64, scratch_operands = 6 : i64, tpu.core_type = #tpu.core_type<tc>, window_params = [{transform_indices = @transform_0, window_bounds = array<i64: 1, 32, 16>}, {pipeline_mode = #tpu.pipeline_mode<synchronous>, transform_indices = @transform_1, window_bounds = array<i64: 48, 32>}, {pipeline_mode = #tpu.pipeline_mode<synchronous>, transform_indices = @transform_2, window_bounds = array<i64: 1, 32>}, {pipeline_mode = #tpu.pipeline_mode<synchronous>, transform_indices = @transform_3, window_bounds = array<i64: 96, 32>}, {pipeline_mode = #tpu.pipeline_mode<synchronous>, transform_indices = @transform_4, window_bounds = array<i64: 1, 32>}, {pipeline_mode = #tpu.pipeline_mode<synchronous>, transform_indices = @transform_5, window_bounds = array<i64: 16, 32>}, {pipeline_mode = #tpu.pipeline_mode<synchronous>, transform_indices = @transform_6, window_bounds = array<i64: 1, 32>}, {pipeline_mode = #tpu.pipeline_mode<synchronous>, transform_indices = @transform_7, window_bounds = array<i64: 96, 64>}, {pipeline_mode = #tpu.pipeline_mode<synchronous>, transform_indices = @transform_8, window_bounds = array<i64: 1, 64>}, {pipeline_mode = #tpu.pipeline_mode<synchronous>, transform_indices = @transform_9, window_bounds = array<i64: 192, 64>}, {pipeline_mode = #tpu.pipeline_mode<synchronous>, transform_indices = @transform_10, window_bounds = array<i64: 1, 64>}, {pipeline_mode = #tpu.pipeline_mode<synchronous>, transform_indices = @transform_11, window_bounds = array<i64: 32, 64>}, {pipeline_mode = #tpu.pipeline_mode<synchronous>, transform_indices = @transform_12, window_bounds = array<i64: 1, 64>}, {pipeline_mode = #tpu.pipeline_mode<synchronous>, transform_indices = @transform_13, window_bounds = array<i64: 192, 128>}, {pipeline_mode = #tpu.pipeline_mode<synchronous>, transform_indices = @transform_14, window_bounds = array<i64: 1, 128>}, {pipeline_mode = #tpu.pipeline_mode<synchronous>, transform_indices = @transform_15, window_bounds = array<i64: 384, 128>}, {pipeline_mode = #tpu.pipeline_mode<synchronous>, transform_indices = @transform_16, window_bounds = array<i64: 1, 128>}, {pipeline_mode = #tpu.pipeline_mode<synchronous>, transform_indices = @transform_17, window_bounds = array<i64: 64, 128>}, {pipeline_mode = #tpu.pipeline_mode<synchronous>, transform_indices = @transform_18, window_bounds = array<i64: 1, 128>}, {transform_indices = @transform_19, window_bounds = array<i64: 1, 32, 128>}]} {
    %c0 = arith.constant 0 : index
    %c0_0 = arith.constant 0 : index
    %c0_1 = arith.constant 0 : index
    %0 = vector.load %arg1[%c0, %c0_0, %c0_1] : memref<1x32x16xf32, #tpu.memory_space<vmem>>, vector<1x32x16xf32>
    %1 = vector.shape_cast %0 : vector<1x32x16xf32> to vector<32x16xf32>
    %cst = arith.constant 0.000000e+00 : f32
    %2 = vector.broadcast %cst : f32 to vector<1x8x16xf32>
    %c0_2 = arith.constant 0 : index
    %c0_3 = arith.constant 0 : index
    %c0_4 = arith.constant 0 : index
    %3 = vector.load %arg21[%c0_2, %c0_3, %c0_4] : memref<1x40x16xf32, #tpu.memory_space<vmem>>, vector<1x8x16xf32>
    tpu.vector_store %arg21[%c0_2, %c0_3, %c0_4], %2 {strides = array<i32>} : memref<1x40x16xf32, #tpu.memory_space<vmem>>, vector<1x8x16xf32>,
    %4 = vector.shape_cast %1 : vector<32x16xf32> to vector<1x32x16xf32>
    %c0_5 = arith.constant 0 : index
    %c8 = arith.constant 8 : index
    %c0_6 = arith.constant 0 : index
    %5 = vector.load %arg21[%c0_5, %c8, %c0_6] : memref<1x40x16xf32, #tpu.memory_space<vmem>>, vector<1x32x16xf32>
    tpu.vector_store %arg21[%c0_5, %c8, %c0_6], %4 {strides = array<i32>} : memref<1x40x16xf32, #tpu.memory_space<vmem>>, vector<1x32x16xf32>,
    %c0_7 = arith.constant 0 : index
    %c6 = arith.constant 6 : index
    %c0_8 = arith.constant 0 : index
    %6 = vector.load %arg21[%c0_7, %c6, %c0_8] : memref<1x40x16xf32, #tpu.memory_space<vmem>>, vector<1x32x16xf32>
    %c0_9 = arith.constant 0 : index
    %c7 = arith.constant 7 : index
    %c0_10 = arith.constant 0 : index
    %7 = vector.load %arg21[%c0_9, %c7, %c0_10] : memref<1x40x16xf32, #tpu.memory_space<vmem>>, vector<1x32x16xf32>
    %c0_11 = arith.constant 0 : index
    %c8_12 = arith.constant 8 : index
    %c0_13 = arith.constant 0 : index
    %8 = vector.load %arg21[%c0_11, %c8_12, %c0_13] : memref<1x40x16xf32, #tpu.memory_space<vmem>>, vector<1x32x16xf32>
    %9 = tpu.concatenate %6, %7, %8 in 2 : vector<1x32x16xf32>, vector<1x32x16xf32>, vector<1x32x16xf32> -> vector<1x32x48xf32>
    %10 = vector.shape_cast %9 : vector<1x32x48xf32> to vector<32x48xf32>
    %11 = arith.truncf %10 : vector<32x48xf32> to vector<32x48xbf16>
    %c0_14 = arith.constant 0 : index
    %c0_15 = arith.constant 0 : index
    %12 = vector.load %arg2[%c0_14, %c0_15] : memref<48x32xbf16, #tpu.memory_space<vmem>>, vector<48x32xbf16>
    %cst_16 = arith.constant dense<0.000000e+00> : vector<32x32xf32>
    %13 = tpu.matmul %11, %12, %cst_16 {dimension_numbers = #tpu.dot_dimension_numbers<[1], [0], [0], [1], [0, 0, 1, 1], [], []>} : vector<32x48xbf16>, vector<48x32xbf16>, vector<32x32xf32> -> vector<32x32xf32>
    %c0_17 = arith.constant 0 : index
    %c0_18 = arith.constant 0 : index
    %14 = vector.load %arg3[%c0_17, %c0_18] : memref<1x32xf32, #tpu.memory_space<vmem>>, vector<1x32xf32>
    %15 = vector.broadcast %14 : vector<1x32xf32> to vector<32x32xf32>
    %16 = arith.addf %13, %15 : vector<32x32xf32>
    %cst_19 = arith.constant 0.000000e+00 : f32
    %17 = vector.broadcast %cst_19 : f32 to vector<32x32xf32>
    %18 = arith.maximumf %16, %17 : vector<32x32xf32>
    %cst_20 = arith.constant 0.000000e+00 : f32
    %19 = vector.broadcast %cst_20 : f32 to vector<1x8x32xf32>
    %c0_21 = arith.constant 0 : index
    %c0_22 = arith.constant 0 : index
    %c0_23 = arith.constant 0 : index
    %20 = vector.load %arg22[%c0_21, %c0_22, %c0_23] : memref<1x40x32xf32, #tpu.memory_space<vmem>>, vector<1x8x32xf32>
    tpu.vector_store %arg22[%c0_21, %c0_22, %c0_23], %19 {strides = array<i32>} : memref<1x40x32xf32, #tpu.memory_space<vmem>>, vector<1x8x32xf32>,
    %21 = vector.shape_cast %18 : vector<32x32xf32> to vector<1x32x32xf32>
    %c0_24 = arith.constant 0 : index
    %c8_25 = arith.constant 8 : index
    %c0_26 = arith.constant 0 : index
    %22 = vector.load %arg22[%c0_24, %c8_25, %c0_26] : memref<1x40x32xf32, #tpu.memory_space<vmem>>, vector<1x32x32xf32>
    tpu.vector_store %arg22[%c0_24, %c8_25, %c0_26], %21 {strides = array<i32>} : memref<1x40x32xf32, #tpu.memory_space<vmem>>, vector<1x32x32xf32>,
    %c0_27 = arith.constant 0 : index
    %c6_28 = arith.constant 6 : index
    %c0_29 = arith.constant 0 : index
    %23 = vector.load %arg22[%c0_27, %c6_28, %c0_29] : memref<1x40x32xf32, #tpu.memory_space<vmem>>, vector<1x32x32xf32>
    %c0_30 = arith.constant 0 : index
    %c7_31 = arith.constant 7 : index
    %c0_32 = arith.constant 0 : index
    %24 = vector.load %arg22[%c0_30, %c7_31, %c0_32] : memref<1x40x32xf32, #tpu.memory_space<vmem>>, vector<1x32x32xf32>
    %c0_33 = arith.constant 0 : index
    %c8_34 = arith.constant 8 : index
    %c0_35 = arith.constant 0 : index
    %25 = vector.load %arg22[%c0_33, %c8_34, %c0_35] : memref<1x40x32xf32, #tpu.memory_space<vmem>>, vector<1x32x32xf32>
    %26 = tpu.concatenate %23, %24, %25 in 2 : vector<1x32x32xf32>, vector<1x32x32xf32>, vector<1x32x32xf32> -> vector<1x32x96xf32>
    %27 = vector.shape_cast %26 : vector<1x32x96xf32> to vector<32x96xf32>
    %28 = arith.truncf %27 : vector<32x96xf32> to vector<32x96xbf16>
    %c0_36 = arith.constant 0 : index
    %c0_37 = arith.constant 0 : index
    %29 = vector.load %arg4[%c0_36, %c0_37] : memref<96x32xbf16, #tpu.memory_space<vmem>>, vector<96x32xbf16>
    %cst_38 = arith.constant dense<0.000000e+00> : vector<32x32xf32>
    %30 = tpu.matmul %28, %29, %cst_38 {dimension_numbers = #tpu.dot_dimension_numbers<[1], [0], [0], [1], [0, 0, 1, 1], [], []>} : vector<32x96xbf16>, vector<96x32xbf16>, vector<32x32xf32> -> vector<32x32xf32>
    %c0_39 = arith.constant 0 : index
    %c0_40 = arith.constant 0 : index
    %31 = vector.load %arg5[%c0_39, %c0_40] : memref<1x32xf32, #tpu.memory_space<vmem>>, vector<1x32xf32>
    %32 = vector.broadcast %31 : vector<1x32xf32> to vector<32x32xf32>
    %33 = arith.addf %30, %32 : vector<32x32xf32>
    %cst_41 = arith.constant 0.000000e+00 : f32
    %34 = vector.broadcast %cst_41 : f32 to vector<32x32xf32>
    %35 = arith.maximumf %33, %34 : vector<32x32xf32>
    %36 = arith.truncf %1 : vector<32x16xf32> to vector<32x16xbf16>
    %c0_42 = arith.constant 0 : index
    %c0_43 = arith.constant 0 : index
    %37 = vector.load %arg6[%c0_42, %c0_43] : memref<16x32xbf16, #tpu.memory_space<vmem>>, vector<16x32xbf16>
    %cst_44 = arith.constant dense<0.000000e+00> : vector<32x32xf32>
    %38 = tpu.matmul %36, %37, %cst_44 {dimension_numbers = #tpu.dot_dimension_numbers<[1], [0], [0], [1], [0, 0, 1, 1], [], []>} : vector<32x16xbf16>, vector<16x32xbf16>, vector<32x32xf32> -> vector<32x32xf32>
    %c0_45 = arith.constant 0 : index
    %c0_46 = arith.constant 0 : index
    %39 = vector.load %arg7[%c0_45, %c0_46] : memref<1x32xf32, #tpu.memory_space<vmem>>, vector<1x32xf32>
    %40 = vector.broadcast %39 : vector<1x32xf32> to vector<32x32xf32>
    %41 = arith.addf %38, %40 : vector<32x32xf32>
    %42 = arith.addf %35, %41 : vector<32x32xf32>
    %cst_47 = arith.constant 0.000000e+00 : f32
    %43 = vector.broadcast %cst_47 : f32 to vector<32x32xf32>
    %44 = arith.maximumf %42, %43 : vector<32x32xf32>
    %cst_48 = arith.constant 0.000000e+00 : f32
    %45 = vector.broadcast %cst_48 : f32 to vector<1x8x32xf32>
    %c0_49 = arith.constant 0 : index
    %c0_50 = arith.constant 0 : index
    %c0_51 = arith.constant 0 : index
    %46 = vector.load %arg23[%c0_49, %c0_50, %c0_51] : memref<1x40x32xf32, #tpu.memory_space<vmem>>, vector<1x8x32xf32>
    tpu.vector_store %arg23[%c0_49, %c0_50, %c0_51], %45 {strides = array<i32>} : memref<1x40x32xf32, #tpu.memory_space<vmem>>, vector<1x8x32xf32>,
    %47 = vector.shape_cast %44 : vector<32x32xf32> to vector<1x32x32xf32>
    %c0_52 = arith.constant 0 : index
    %c8_53 = arith.constant 8 : index
    %c0_54 = arith.constant 0 : index
    %48 = vector.load %arg23[%c0_52, %c8_53, %c0_54] : memref<1x40x32xf32, #tpu.memory_space<vmem>>, vector<1x32x32xf32>
    tpu.vector_store %arg23[%c0_52, %c8_53, %c0_54], %47 {strides = array<i32>} : memref<1x40x32xf32, #tpu.memory_space<vmem>>, vector<1x32x32xf32>,
    %c0_55 = arith.constant 0 : index
    %c4 = arith.constant 4 : index
    %c0_56 = arith.constant 0 : index
    %49 = vector.load %arg23[%c0_55, %c4, %c0_56] : memref<1x40x32xf32, #tpu.memory_space<vmem>>, vector<1x32x32xf32>
    %c0_57 = arith.constant 0 : index
    %c6_58 = arith.constant 6 : index
    %c0_59 = arith.constant 0 : index
    %50 = vector.load %arg23[%c0_57, %c6_58, %c0_59] : memref<1x40x32xf32, #tpu.memory_space<vmem>>, vector<1x32x32xf32>
    %c0_60 = arith.constant 0 : index
    %c8_61 = arith.constant 8 : index
    %c0_62 = arith.constant 0 : index
    %51 = vector.load %arg23[%c0_60, %c8_61, %c0_62] : memref<1x40x32xf32, #tpu.memory_space<vmem>>, vector<1x32x32xf32>
    %52 = tpu.concatenate %49, %50, %51 in 2 : vector<1x32x32xf32>, vector<1x32x32xf32>, vector<1x32x32xf32> -> vector<1x32x96xf32>
    %53 = vector.shape_cast %52 : vector<1x32x96xf32> to vector<32x96xf32>
    %54 = arith.truncf %53 : vector<32x96xf32> to vector<32x96xbf16>
    %c0_63 = arith.constant 0 : index
    %c0_64 = arith.constant 0 : index
    %55 = vector.load %arg8[%c0_63, %c0_64] : memref<96x64xbf16, #tpu.memory_space<vmem>>, vector<96x64xbf16>
    %cst_65 = arith.constant dense<0.000000e+00> : vector<32x64xf32>
    %56 = tpu.matmul %54, %55, %cst_65 {dimension_numbers = #tpu.dot_dimension_numbers<[1], [0], [0], [1], [0, 0, 1, 1], [], []>} : vector<32x96xbf16>, vector<96x64xbf16>, vector<32x64xf32> -> vector<32x64xf32>
    %c0_66 = arith.constant 0 : index
    %c0_67 = arith.constant 0 : index
    %57 = vector.load %arg9[%c0_66, %c0_67] : memref<1x64xf32, #tpu.memory_space<vmem>>, vector<1x64xf32>
    %58 = vector.broadcast %57 : vector<1x64xf32> to vector<32x64xf32>
    %59 = arith.addf %56, %58 : vector<32x64xf32>
    %cst_68 = arith.constant 0.000000e+00 : f32
    %60 = vector.broadcast %cst_68 : f32 to vector<32x64xf32>
    %61 = arith.maximumf %59, %60 : vector<32x64xf32>
    %cst_69 = arith.constant 0.000000e+00 : f32
    %62 = vector.broadcast %cst_69 : f32 to vector<1x8x64xf32>
    %c0_70 = arith.constant 0 : index
    %c0_71 = arith.constant 0 : index
    %c0_72 = arith.constant 0 : index
    %63 = vector.load %arg24[%c0_70, %c0_71, %c0_72] : memref<1x40x64xf32, #tpu.memory_space<vmem>>, vector<1x8x64xf32>
    tpu.vector_store %arg24[%c0_70, %c0_71, %c0_72], %62 {strides = array<i32>} : memref<1x40x64xf32, #tpu.memory_space<vmem>>, vector<1x8x64xf32>,
    %64 = vector.shape_cast %61 : vector<32x64xf32> to vector<1x32x64xf32>
    %c0_73 = arith.constant 0 : index
    %c8_74 = arith.constant 8 : index
    %c0_75 = arith.constant 0 : index
    %65 = vector.load %arg24[%c0_73, %c8_74, %c0_75] : memref<1x40x64xf32, #tpu.memory_space<vmem>>, vector<1x32x64xf32>
    tpu.vector_store %arg24[%c0_73, %c8_74, %c0_75], %64 {strides = array<i32>} : memref<1x40x64xf32, #tpu.memory_space<vmem>>, vector<1x32x64xf32>,
    %c0_76 = arith.constant 0 : index
    %c4_77 = arith.constant 4 : index
    %c0_78 = arith.constant 0 : index
    %66 = vector.load %arg24[%c0_76, %c4_77, %c0_78] : memref<1x40x64xf32, #tpu.memory_space<vmem>>, vector<1x32x64xf32>
    %c0_79 = arith.constant 0 : index
    %c6_80 = arith.constant 6 : index
    %c0_81 = arith.constant 0 : index
    %67 = vector.load %arg24[%c0_79, %c6_80, %c0_81] : memref<1x40x64xf32, #tpu.memory_space<vmem>>, vector<1x32x64xf32>
    %c0_82 = arith.constant 0 : index
    %c8_83 = arith.constant 8 : index
    %c0_84 = arith.constant 0 : index
    %68 = vector.load %arg24[%c0_82, %c8_83, %c0_84] : memref<1x40x64xf32, #tpu.memory_space<vmem>>, vector<1x32x64xf32>
    %69 = tpu.concatenate %66, %67, %68 in 2 : vector<1x32x64xf32>, vector<1x32x64xf32>, vector<1x32x64xf32> -> vector<1x32x192xf32>
    %70 = vector.shape_cast %69 : vector<1x32x192xf32> to vector<32x192xf32>
    %71 = arith.truncf %70 : vector<32x192xf32> to vector<32x192xbf16>
    %c0_85 = arith.constant 0 : index
    %c0_86 = arith.constant 0 : index
    %72 = vector.load %arg10[%c0_85, %c0_86] : memref<192x64xbf16, #tpu.memory_space<vmem>>, vector<192x64xbf16>
    %cst_87 = arith.constant dense<0.000000e+00> : vector<32x64xf32>
    %73 = tpu.matmul %71, %72, %cst_87 {dimension_numbers = #tpu.dot_dimension_numbers<[1], [0], [0], [1], [0, 0, 1, 1], [], []>} : vector<32x192xbf16>, vector<192x64xbf16>, vector<32x64xf32> -> vector<32x64xf32>
    %c0_88 = arith.constant 0 : index
    %c0_89 = arith.constant 0 : index
    %74 = vector.load %arg11[%c0_88, %c0_89] : memref<1x64xf32, #tpu.memory_space<vmem>>, vector<1x64xf32>
    %75 = vector.broadcast %74 : vector<1x64xf32> to vector<32x64xf32>
    %76 = arith.addf %73, %75 : vector<32x64xf32>
    %cst_90 = arith.constant 0.000000e+00 : f32
    %77 = vector.broadcast %cst_90 : f32 to vector<32x64xf32>
    %78 = arith.maximumf %76, %77 : vector<32x64xf32>
    %79 = arith.truncf %44 : vector<32x32xf32> to vector<32x32xbf16>
    %c0_91 = arith.constant 0 : index
    %c0_92 = arith.constant 0 : index
    %80 = vector.load %arg12[%c0_91, %c0_92] : memref<32x64xbf16, #tpu.memory_space<vmem>>, vector<32x64xbf16>
    %cst_93 = arith.constant dense<0.000000e+00> : vector<32x64xf32>
    %81 = tpu.matmul %79, %80, %cst_93 {dimension_numbers = #tpu.dot_dimension_numbers<[1], [0], [0], [1], [0, 0, 1, 1], [], []>} : vector<32x32xbf16>, vector<32x64xbf16>, vector<32x64xf32> -> vector<32x64xf32>
    %c0_94 = arith.constant 0 : index
    %c0_95 = arith.constant 0 : index
    %82 = vector.load %arg13[%c0_94, %c0_95] : memref<1x64xf32, #tpu.memory_space<vmem>>, vector<1x64xf32>
    %83 = vector.broadcast %82 : vector<1x64xf32> to vector<32x64xf32>
    %84 = arith.addf %81, %83 : vector<32x64xf32>
    %85 = arith.addf %78, %84 : vector<32x64xf32>
    %cst_96 = arith.constant 0.000000e+00 : f32
    %86 = vector.broadcast %cst_96 : f32 to vector<32x64xf32>
    %87 = arith.maximumf %85, %86 : vector<32x64xf32>
    %cst_97 = arith.constant 0.000000e+00 : f32
    %88 = vector.broadcast %cst_97 : f32 to vector<1x8x64xf32>
    %c0_98 = arith.constant 0 : index
    %c0_99 = arith.constant 0 : index
    %c0_100 = arith.constant 0 : index
    %89 = vector.load %arg25[%c0_98, %c0_99, %c0_100] : memref<1x40x64xf32, #tpu.memory_space<vmem>>, vector<1x8x64xf32>
    tpu.vector_store %arg25[%c0_98, %c0_99, %c0_100], %88 {strides = array<i32>} : memref<1x40x64xf32, #tpu.memory_space<vmem>>, vector<1x8x64xf32>,
    %90 = vector.shape_cast %87 : vector<32x64xf32> to vector<1x32x64xf32>
    %c0_101 = arith.constant 0 : index
    %c8_102 = arith.constant 8 : index
    %c0_103 = arith.constant 0 : index
    %91 = vector.load %arg25[%c0_101, %c8_102, %c0_103] : memref<1x40x64xf32, #tpu.memory_space<vmem>>, vector<1x32x64xf32>
    tpu.vector_store %arg25[%c0_101, %c8_102, %c0_103], %90 {strides = array<i32>} : memref<1x40x64xf32, #tpu.memory_space<vmem>>, vector<1x32x64xf32>,
    %c0_104 = arith.constant 0 : index
    %c0_105 = arith.constant 0 : index
    %c0_106 = arith.constant 0 : index
    %92 = vector.load %arg25[%c0_104, %c0_105, %c0_106] : memref<1x40x64xf32, #tpu.memory_space<vmem>>, vector<1x32x64xf32>
    %c0_107 = arith.constant 0 : index
    %c4_108 = arith.constant 4 : index
    %c0_109 = arith.constant 0 : index
    %93 = vector.load %arg25[%c0_107, %c4_108, %c0_109] : memref<1x40x64xf32, #tpu.memory_space<vmem>>, vector<1x32x64xf32>
    %c0_110 = arith.constant 0 : index
    %c8_111 = arith.constant 8 : index
    %c0_112 = arith.constant 0 : index
    %94 = vector.load %arg25[%c0_110, %c8_111, %c0_112] : memref<1x40x64xf32, #tpu.memory_space<vmem>>, vector<1x32x64xf32>
    %95 = tpu.concatenate %92, %93, %94 in 2 : vector<1x32x64xf32>, vector<1x32x64xf32>, vector<1x32x64xf32> -> vector<1x32x192xf32>
    %96 = vector.shape_cast %95 : vector<1x32x192xf32> to vector<32x192xf32>
    %97 = arith.truncf %96 : vector<32x192xf32> to vector<32x192xbf16>
    %c0_113 = arith.constant 0 : index
    %c0_114 = arith.constant 0 : index
    %98 = vector.load %arg14[%c0_113, %c0_114] : memref<192x128xbf16, #tpu.memory_space<vmem>>, vector<192x128xbf16>
    %cst_115 = arith.constant dense<0.000000e+00> : vector<32x128xf32>
    %99 = tpu.matmul %97, %98, %cst_115 {dimension_numbers = #tpu.dot_dimension_numbers<[1], [0], [0], [1], [0, 0, 1, 1], [], []>} : vector<32x192xbf16>, vector<192x128xbf16>, vector<32x128xf32> -> vector<32x128xf32>
    %c0_116 = arith.constant 0 : index
    %c0_117 = arith.constant 0 : index
    %100 = vector.load %arg15[%c0_116, %c0_117] : memref<1x128xf32, #tpu.memory_space<vmem>>, vector<1x128xf32>
    %101 = vector.broadcast %100 : vector<1x128xf32> to vector<32x128xf32>
    %102 = arith.addf %99, %101 : vector<32x128xf32>
    %cst_118 = arith.constant 0.000000e+00 : f32
    %103 = vector.broadcast %cst_118 : f32 to vector<32x128xf32>
    %104 = arith.maximumf %102, %103 : vector<32x128xf32>
    %cst_119 = arith.constant 0.000000e+00 : f32
    %105 = vector.broadcast %cst_119 : f32 to vector<1x8x128xf32>
    %c0_120 = arith.constant 0 : index
    %c0_121 = arith.constant 0 : index
    %c0_122 = arith.constant 0 : index
    %106 = vector.load %arg26[%c0_120, %c0_121, %c0_122] : memref<1x40x128xf32, #tpu.memory_space<vmem>>, vector<1x8x128xf32>
    tpu.vector_store %arg26[%c0_120, %c0_121, %c0_122], %105 {strides = array<i32>} : memref<1x40x128xf32, #tpu.memory_space<vmem>>, vector<1x8x128xf32>,
    %107 = vector.shape_cast %104 : vector<32x128xf32> to vector<1x32x128xf32>
    %c0_123 = arith.constant 0 : index
    %c8_124 = arith.constant 8 : index
    %c0_125 = arith.constant 0 : index
    %108 = vector.load %arg26[%c0_123, %c8_124, %c0_125] : memref<1x40x128xf32, #tpu.memory_space<vmem>>, vector<1x32x128xf32>
    tpu.vector_store %arg26[%c0_123, %c8_124, %c0_125], %107 {strides = array<i32>} : memref<1x40x128xf32, #tpu.memory_space<vmem>>, vector<1x32x128xf32>,
    %c0_126 = arith.constant 0 : index
    %c0_127 = arith.constant 0 : index
    %c0_128 = arith.constant 0 : index
    %109 = vector.load %arg26[%c0_126, %c0_127, %c0_128] : memref<1x40x128xf32, #tpu.memory_space<vmem>>, vector<1x32x128xf32>
    %c0_129 = arith.constant 0 : index
    %c4_130 = arith.constant 4 : index
    %c0_131 = arith.constant 0 : index
    %110 = vector.load %arg26[%c0_129, %c4_130, %c0_131] : memref<1x40x128xf32, #tpu.memory_space<vmem>>, vector<1x32x128xf32>
    %c0_132 = arith.constant 0 : index
    %c8_133 = arith.constant 8 : index
    %c0_134 = arith.constant 0 : index
    %111 = vector.load %arg26[%c0_132, %c8_133, %c0_134] : memref<1x40x128xf32, #tpu.memory_space<vmem>>, vector<1x32x128xf32>
    %112 = tpu.concatenate %109, %110, %111 in 2 : vector<1x32x128xf32>, vector<1x32x128xf32>, vector<1x32x128xf32> -> vector<1x32x384xf32>
    %113 = vector.shape_cast %112 : vector<1x32x384xf32> to vector<32x384xf32>
    %114 = arith.truncf %113 : vector<32x384xf32> to vector<32x384xbf16>
    %c0_135 = arith.constant 0 : index
    %c0_136 = arith.constant 0 : index
    %115 = vector.load %arg16[%c0_135, %c0_136] : memref<384x128xbf16, #tpu.memory_space<vmem>>, vector<384x128xbf16>
    %cst_137 = arith.constant dense<0.000000e+00> : vector<32x128xf32>
    %116 = tpu.matmul %114, %115, %cst_137 {dimension_numbers = #tpu.dot_dimension_numbers<[1], [0], [0], [1], [0, 0, 1, 1], [], []>} : vector<32x384xbf16>, vector<384x128xbf16>, vector<32x128xf32> -> vector<32x128xf32>
    %c0_138 = arith.constant 0 : index
    %c0_139 = arith.constant 0 : index
    %117 = vector.load %arg17[%c0_138, %c0_139] : memref<1x128xf32, #tpu.memory_space<vmem>>, vector<1x128xf32>
    %118 = vector.broadcast %117 : vector<1x128xf32> to vector<32x128xf32>
    %119 = arith.addf %116, %118 : vector<32x128xf32>
    %cst_140 = arith.constant 0.000000e+00 : f32
    %120 = vector.broadcast %cst_140 : f32 to vector<32x128xf32>
    %121 = arith.maximumf %119, %120 : vector<32x128xf32>
    %122 = arith.truncf %87 : vector<32x64xf32> to vector<32x64xbf16>
    %c0_141 = arith.constant 0 : index
    %c0_142 = arith.constant 0 : index
    %123 = vector.load %arg18[%c0_141, %c0_142] : memref<64x128xbf16, #tpu.memory_space<vmem>>, vector<64x128xbf16>
    %cst_143 = arith.constant dense<0.000000e+00> : vector<32x128xf32>
    %124 = tpu.matmul %122, %123, %cst_143 {dimension_numbers = #tpu.dot_dimension_numbers<[1], [0], [0], [1], [0, 0, 1, 1], [], []>} : vector<32x64xbf16>, vector<64x128xbf16>, vector<32x128xf32> -> vector<32x128xf32>
    %c0_144 = arith.constant 0 : index
    %c0_145 = arith.constant 0 : index
    %125 = vector.load %arg19[%c0_144, %c0_145] : memref<1x128xf32, #tpu.memory_space<vmem>>, vector<1x128xf32>
    %126 = vector.broadcast %125 : vector<1x128xf32> to vector<32x128xf32>
    %127 = arith.addf %124, %126 : vector<32x128xf32>
    %128 = arith.addf %121, %127 : vector<32x128xf32>
    %cst_146 = arith.constant 0.000000e+00 : f32
    %129 = vector.broadcast %cst_146 : f32 to vector<32x128xf32>
    %130 = arith.maximumf %128, %129 : vector<32x128xf32>
    %131 = vector.shape_cast %130 : vector<32x128xf32> to vector<1x32x128xf32>
    %c0_147 = arith.constant 0 : index
    %c0_148 = arith.constant 0 : index
    %c0_149 = arith.constant 0 : index
    %132 = vector.load %arg20[%c0_147, %c0_148, %c0_149] : memref<1x32x128xf32, #tpu.memory_space<vmem>>, vector<1x32x128xf32>
    tpu.vector_store %arg20[%c0_147, %c0_148, %c0_149], %131 {strides = array<i32>} : memref<1x32x128xf32, #tpu.memory_space<vmem>>, vector<1x32x128xf32>,
    return
  }
  func.func @transform_0(%arg0: i32) -> (i32, i32, i32) {
    %c0_i32 = arith.constant 0 : i32
    %c0_i32_0 = arith.constant 0 : i32
    %c0_i32_1 = arith.constant 0 : i32
    return %arg0, %c0_i32, %c0_i32_0 : i32, i32, i32
  }
  func.func @transform_1(%arg0: i32) -> (i32, i32) {
    %c0_i32 = arith.constant 0 : i32
    %c0_i32_0 = arith.constant 0 : i32
    %c0_i32_1 = arith.constant 0 : i32
    return %c0_i32, %c0_i32_0 : i32, i32
  }
  func.func @transform_2(%arg0: i32) -> (i32, i32) {
    %c0_i32 = arith.constant 0 : i32
    %c0_i32_0 = arith.constant 0 : i32
    %c0_i32_1 = arith.constant 0 : i32
    return %c0_i32, %c0_i32_0 : i32, i32
  }
  func.func @transform_3(%arg0: i32) -> (i32, i32) {
    %c0_i32 = arith.constant 0 : i32
    %c0_i32_0 = arith.constant 0 : i32
    %c0_i32_1 = arith.constant 0 : i32
    return %c0_i32, %c0_i32_0 : i32, i32
  }
  func.func @transform_4(%arg0: i32) -> (i32, i32) {
    %c0_i32 = arith.constant 0 : i32
    %c0_i32_0 = arith.constant 0 : i32
    %c0_i32_1 = arith.constant 0 : i32
    return %c0_i32, %c0_i32_0 : i32, i32
  }
  func.func @transform_5(%arg0: i32) -> (i32, i32) {
    %c0_i32 = arith.constant 0 : i32
    %c0_i32_0 = arith.constant 0 : i32
    %c0_i32_1 = arith.constant 0 : i32
    return %c0_i32, %c0_i32_0 : i32, i32
  }
  func.func @transform_6(%arg0: i32) -> (i32, i32) {
    %c0_i32 = arith.constant 0 : i32
    %c0_i32_0 = arith.constant 0 : i32
    %c0_i32_1 = arith.constant 0 : i32
    return %c0_i32, %c0_i32_0 : i32, i32
  }
  func.func @transform_7(%arg0: i32) -> (i32, i32) {
    %c0_i32 = arith.constant 0 : i32
    %c0_i32_0 = arith.constant 0 : i32
    %c0_i32_1 = arith.constant 0 : i32
    return %c0_i32, %c0_i32_0 : i32, i32
  }
  func.func @transform_8(%arg0: i32) -> (i32, i32) {
    %c0_i32 = arith.constant 0 : i32
    %c0_i32_0 = arith.constant 0 : i32
    %c0_i32_1 = arith.constant 0 : i32
    return %c0_i32, %c0_i32_0 : i32, i32
  }
  func.func @transform_9(%arg0: i32) -> (i32, i32) {
    %c0_i32 = arith.constant 0 : i32
    %c0_i32_0 = arith.constant 0 : i32
    %c0_i32_1 = arith.constant 0 : i32
    return %c0_i32, %c0_i32_0 : i32, i32
  }
  func.func @transform_10(%arg0: i32) -> (i32, i32) {
    %c0_i32 = arith.constant 0 : i32
    %c0_i32_0 = arith.constant 0 : i32
    %c0_i32_1 = arith.constant 0 : i32
    return %c0_i32, %c0_i32_0 : i32, i32
  }
  func.func @transform_11(%arg0: i32) -> (i32, i32) {
    %c0_i32 = arith.constant 0 : i32
    %c0_i32_0 = arith.constant 0 : i32
    %c0_i32_1 = arith.constant 0 : i32
    return %c0_i32, %c0_i32_0 : i32, i32
  }
  func.func @transform_12(%arg0: i32) -> (i32, i32) {
    %c0_i32 = arith.constant 0 : i32
    %c0_i32_0 = arith.constant 0 : i32
    %c0_i32_1 = arith.constant 0 : i32
    return %c0_i32, %c0_i32_0 : i32, i32
  }
  func.func @transform_13(%arg0: i32) -> (i32, i32) {
    %c0_i32 = arith.constant 0 : i32
    %c0_i32_0 = arith.constant 0 : i32
    %c0_i32_1 = arith.constant 0 : i32
    return %c0_i32, %c0_i32_0 : i32, i32
  }
  func.func @transform_14(%arg0: i32) -> (i32, i32) {
    %c0_i32 = arith.constant 0 : i32
    %c0_i32_0 = arith.constant 0 : i32
    %c0_i32_1 = arith.constant 0 : i32
    return %c0_i32, %c0_i32_0 : i32, i32
  }
  func.func @transform_15(%arg0: i32) -> (i32, i32) {
    %c0_i32 = arith.constant 0 : i32
    %c0_i32_0 = arith.constant 0 : i32
    %c0_i32_1 = arith.constant 0 : i32
    return %c0_i32, %c0_i32_0 : i32, i32
  }
  func.func @transform_16(%arg0: i32) -> (i32, i32) {
    %c0_i32 = arith.constant 0 : i32
    %c0_i32_0 = arith.constant 0 : i32
    %c0_i32_1 = arith.constant 0 : i32
    return %c0_i32, %c0_i32_0 : i32, i32
  }
  func.func @transform_17(%arg0: i32) -> (i32, i32) {
    %c0_i32 = arith.constant 0 : i32
    %c0_i32_0 = arith.constant 0 : i32
    %c0_i32_1 = arith.constant 0 : i32
    return %c0_i32, %c0_i32_0 : i32, i32
  }
  func.func @transform_18(%arg0: i32) -> (i32, i32) {
    %c0_i32 = arith.constant 0 : i32
    %c0_i32_0 = arith.constant 0 : i32
    %c0_i32_1 = arith.constant 0 : i32
    return %c0_i32, %c0_i32_0 : i32, i32
  }
  func.func @transform_19(%arg0: i32) -> (i32, i32, i32) {
    %c0_i32 = arith.constant 0 : i32
    %c0_i32_0 = arith.constant 0 : i32
    %c0_i32_1 = arith.constant 0 : i32
    return %arg0, %c0_i32, %c0_i32_0 : i32, i32, i32
  }
}

</mosaic_0001>

<bundles_post_ra>
// kernel: tpu_custom_call.1
= control target key start
LH: loop header
LB: loop body
LE: loop exit
PB: predicated region body
PF: predicated region fallthrough
CT: control target
= control target key end

     0   :  { %s3112_s0 = inlined_call_operand.vmem [shape: f32[2,32,16], index: 0, kind: input, shape index: {}]   ;;  %s3113_s1 = inlined_call_operand.vmem [shape: bf16[48,32], index: 1, kind: input, shape index: {}]   ;;  %s3114_s2 = inlined_call_operand.vmem [shape: f32[1,32], index: 2, kind: input, shape index: {}]   ;;  %s3115_s3 = inlined_call_operand.vmem [shape: bf16[96,32], index: 3, kind: input, shape index: {}]   ;;  %s3116_s4 = inlined_call_operand.vmem [shape: f32[1,32], index: 4, kind: input, shape index: {}]   ;;  %s3117_s5 = inlined_call_operand.vmem [shape: bf16[16,32], index: 5, kind: input, shape index: {}]   ;;  %s3118_s6 = inlined_call_operand.vmem [shape: f32[1,32], index: 6, kind: input, shape index: {}]   ;;  %s3119_s7 = inlined_call_operand.vmem [shape: bf16[96,64], index: 7, kind: input, shape index: {}]   ;;  %s3120_s8 = inlined_call_operand.vmem [shape: f32[1,64], index: 8, kind: input, shape index: {}]   ;;  %s3121_s9 = inlined_call_operand.vmem [shape: bf16[192,64], index: 9, kind: input, shape index: {}]   ;;  %s3122_s10 = inlined_call_operand.vmem [shape: f32[1,64], index: 10, kind: input, shape index: {}]   ;;  %s3123_s11 = inlined_call_operand.vmem [shape: bf16[32,64], index: 11, kind: input, shape index: {}]   ;;  %s3124_s12 = inlined_call_operand.vmem [shape: f32[1,64], index: 12, kind: input, shape index: {}]   ;;  %s3125_s13 = inlined_call_operand.hbm [shape: bf16[192,128], index: 13, kind: input, shape index: {}]   ;;  %s3126_s14 = inlined_call_operand.vmem [shape: f32[1,128], index: 14, kind: input, shape index: {}]   ;;  %s3127_s15 = inlined_call_operand.vmem [shape: bf16[384,128], index: 15, kind: input, shape index: {}]   ;;  %s3128_s16 = inlined_call_operand.vmem [shape: f32[1,128], index: 16, kind: input, shape index: {}]   ;;  %s3129_s17 = inlined_call_operand.vmem [shape: bf16[64,128], index: 17, kind: input, shape index: {}]   ;;  %s3130_s18 = inlined_call_operand.vmem [shape: f32[1,128], index: 18, kind: input, shape index: {}]   ;;  %s3131_s19 = inlined_call_operand.hbm [shape: f32[2,32,128], index: 19, kind: output, shape index: {}]  }
   0x1   :  { %3142 = sst [smem:[#allocation17_spill]] %s3112_s0 }
   0x2   :  { %3143 = sst [smem:[#allocation18_spill]] %s3113_s1 }
   0x3   :  { %3144 = sst [smem:[#allocation19_spill]] %s3114_s2 }
   0x4   :  { %3145 = sst [smem:[#allocation20_spill]] %s3115_s3 }
   0x5   :  { %3146 = sst [smem:[#allocation21_spill]] %s3116_s4 }
   0x6   :  { %3147 = sst [smem:[#allocation22_spill]] %s3117_s5 }
   0x7   :  { %3148 = sst [smem:[#allocation23_spill]] %s3125_s13 }
   0x8   :  { %24 = vsyncpa [#allocation9], 0 }
   0x9   :  { %25 = vsyncpa [#allocation10], 0 }
   0xa   :  { %27 = vsyncpa [#allocation10 + $0x1], 0  ;;  %s2690_s0 = smov 0   ;;  %s2692_s30 = smov 0  }
   0xb   :  { %s2694_s20 = smov 0   ;;  %s2696_s21 = smov 0  }
   0xc LB: > { %3149 = sst [smem:[#allocation14_spill]] %s2575_s20  ;;  %s2711_s1 = sadd.s32 4294967295, %s2579_s21   ;;  %s2579_s21 = sphi %s2696_s21, %s3163_s21   ;;  %s2575_s20 = sphi %s2694_s20, %s3165_s20   ;;  %s2571_s30 = sphi %s2692_s30, %s3167_s30   ;;  %s2567_s0 = sphi %s2690_s0, %s3166_s0  }
   0xd   : > { %s1946_s22 = sadd.s32 4294967294, %s2579_s21   ;;  %s2715_s2 = sadd.s32 1, %s2579_s21  }
   0xe   : > { %3150 = sst [smem:[#allocation15_spill]] %s2715_s2  ;;  %s444_s23 = sadd.s32 1, %s2575_s20 }
   0xf   : > { %s441_s24 = ssub.s32 %s2579_s21, %s2715_s2  ;;  %p454_p0 = scmp.ne.s32.totalorder %s2575_s20, %s2571_s30 }
  0x10   : > { %p442_p1 = scmp.eq.s32.totalorder %s441_s24, 0  ;;  %p455_p2 = scmp.eq.s32.totalorder %s2711_s1, 1 }
  0x11   : > { %p460_p3 = scmp.ne.s32.totalorder %s2571_s30, %s2567_s0  ;;  %p461_p4 = scmp.eq.s32.totalorder %s1946_s22, 1 }
  0x12   : > { %s2726_s25 = scalar_select %p442_p1, %s2575_s20, %s444_s23  }
  0x13   : > { %p2728_p5 = por %p455_p2, %p454_p0  ;;  %p2732_p6 = por %p461_p4, %p460_p3 }
  0x14   : > { %3151 = sst [smem:[#allocation16_spill]] %s2726_s25  ;;  %p1947_p7 = scmp.ge.s32.totalorder %s2579_s21, 1 }
  0x15   : > { %p468_p8 = scmp.lt.s32.totalorder %s2579_s21, 3  ;;  %p2350_p9 = scmp.eq.s32.totalorder %s2711_s1, 0 }
  0x16   : > { %s3154_s13 = sld [smem:[#allocation23_spill]]  ;;  %s2581_s22 = smov [#allocation8]  }
  0x17   : > { %p469_p10 = pnand %p1947_p7, %p468_p8  ;;  %s517_s23 = sshll.u32 %s2581_s22, 4  ;;  %s518_s23 = int_to_ptr.vmem [resolvable:$true] %s517_s23 }
  0x18   : > { %s2582_s24 = smov 64   ;;  %s2583_s25 = smov 4  }
  0x19   : > { %p2342_p11 = pneg %p469_p10  ;;  %556 = sbr.rel (%p469_p10) target bundleno = 1595 (0x63b), region = 96 }
  0x1b   : > { %p2343_p12 = pnand %p2350_p9, %p2342_p11 }
  0x1c   : > { %s515_s29 = sshll.u32 %s3154_s13, 4  ;;  %s516_s29 = int_to_ptr.hbm [resolvable:$true] %s515_s29 }
  0x1d   : > { %2345 = dma.hbm_to_vmem [thread:$0]  (!%p2343_p12), %s516_s29, 1536, %s518_s23, [#allocation9], %s2582_s24, %s2582_s24, %s2583_s25  }
  0x1e   : > { %2558 = dma.done.wait (%p2350_p9), [#allocation9], 1536  }
  0x1f   : > { %2560 = vsyncadd (%p2350_p9), [#allocation9], 4294965760  ;;  %p613_p13 = scmp.lt.s32.totalorder %s2711_s1, 1  ;;  %vm623_vm0 = vcmask 130048   ;;  %v2584_v0 = vmov 0.0   ;;  %s3155_s22 = sld [smem:[#allocation17_spill]] }
  0x20   : > { %624 = vst.msk [vmem:[#allocation2] sm:$0xff] %vm623_vm0, %v2584_v0  ;;  %s2585_s24 = smov 16   ;;  %s3156_s29 = sld [smem:[#allocation18_spill]]  ;;  %vm677_vm1 = vcmask 261120   ;;  %vm712_vm2 = vcmask 392192   ;;  %vm795_vm3 = vcmask 523264  }
  0x21   : > { %s614_s27 = scalar_select %p613_p13, %s2711_s1, 1  ;;  %1501 = vst [vmem:[#allocation7] sm:$0xff] %v2584_v0  ;;  %vm854_vm4 = vcmask 785408  }
  0x22   : > { %742 = vst.msk [vmem:[#allocation3] sm:$0xff] %vm677_vm1, %v2584_v0  ;;  %s3157_s25 = sld [smem:[#allocation19_spill]]  ;;  %s3162_s20 = smov 64  }
  0x23   : > { %s2256_s28 = sshll.u32 %s614_s27, 5  ;;  %s3134_s27 = smov 32   ;;  %931 = vst.msk [vmem:[#allocation4] sm:$0xff] %vm677_vm1, %v2584_v0 }
  0x24   : > { %s3160_s5 = sld [smem:[#allocation22_spill]]  ;;  %1071 = vst.msk [vmem:[#allocation5] sm:$0xff] %vm795_vm3, %v2584_v0 }
  0x25   : > { %s617_s23 = scalar_lea.vmem %s3155_s22, %s2256_s28  ;;  %1315 = vst.msk [vmem:[#allocation6] sm:$0xff] %vm795_vm3, %v2584_v0  ;;  %s3161_s4 = sld [smem:[#allocation21_spill]] }
  0x26   : > { %v2756_v1 = vld [vmem:[%s617_s23] sm:$0xff]  ;;  %v2758_v2 = vld [vmem:[%s617_s23 + $0x8] sm:$0xff]  ;;  %v2760_v3 = vld [vmem:[%s617_s23 + $0x10] sm:$0xff] }
  0x27   : > { %625 = vst.msk [vmem:[#allocation2 + $0x8] sm:$0xff] %vm623_vm0, %v2756_v1  ;;  %v2764_v4 = vld [vmem:[%s617_s23 + $0x18] sm:$0xff]  ;;  %v2259_v17 = vld [vmem:[%s3156_s29 + $0x10] sm:$0xff]  ;;  %v2258_v18 = vld [vmem:[%s3156_s29 + $0x8] sm:$0xff] }
  0x28   : > { %626 = vst.msk [vmem:[#allocation2 + $0x10] sm:$0xff] %vm623_vm0, %v2758_v2  ;;  %724 = vmatpush.bf16.msra.mxu0 %v2259_v17  ;;  %v2257_v19 = vld [vmem:[%s3156_s29] sm:$0xff] }
  0x29   : > { %627 = vst.msk [vmem:[#allocation2 + $0x18] sm:$0xff] %vm623_vm0, %v2760_v3  ;;  %v2474_v46 = vld [vmem:[%s3157_s25] ss:$0 sm:$0xff]  ;;  %s3159_s25 = smov 32  }
  0x2a   : > { %628 = vst.msk [vmem:[#allocation2 + $0x20] sm:$0xff] %vm623_vm0, %v2764_v4  ;;  %v2266_v17 = vld [vmem:[%s3160_s5] sm:$0xff] }
  0x2b   : > { %911 = vmatpush.bf16.msra.mxu2 %v2266_v17 }
  0x2c   : > { %725 = vmatpush.bf16.msra.mxu0 %v2258_v18  ;;  %v884_v18 = vpack.c.bf16 %v2758_v2, %v2756_v1 }
  0x2e   : > { %v633_v5 = vld [vmem:[#allocation2 + $0x7] sm:$0xff]  ;;  %1999 = vmatmul.msk.bf16.vlgmr.msra.gmra.mxu2 %vm623_vm0, %v884_v18 }
  0x2f   : > { %v634_v6 = vld [vmem:[#allocation2 + $0xf] sm:$0xff]  ;;  %v629_v23 = vld [vmem:[#allocation2 + $0x6] sm:$0xff] }
  0x30   : > { %v2394_v7 = vpack.i.bf16 %v634_v6, %v633_v5  ;;  %v635_v8 = vld [vmem:[#allocation2 + $0x17] sm:$0xff]  ;;  %v637_v11 = vld [vmem:[#allocation2 + $0x8] sm:$0xff]  ;;  %726 = vmatpush.bf16.msra.mxu0 %v2257_v19 }
  0x31   : > { %v636_v9 = vld [vmem:[#allocation2 + $0x1f] sm:$0xff]  ;;  %v638_v12 = vld [vmem:[#allocation2 + $0x10] sm:$0xff] }
  0x32   : > { %2395 = vrot.lane.b32.xlu0 %v2394_v7, %s2585_s24  ;;  %v2404_v10 = vpack.i.bf16 %v636_v9, %v635_v8  ;;  %v639_v13 = vld [vmem:[#allocation2 + $0x18] sm:$0xff]  ;;  %v640_v14 = vld [vmem:[#allocation2 + $0x20] sm:$0xff]  ;;  %v2399_v15 = vpack.i.bf16 %v638_v12, %v637_v11  ;;  %v630_v24 = vld [vmem:[#allocation2 + $0xe] sm:$0xff] }
  0x33   : > { %v2409_v16 = vpack.i.bf16 %v640_v14, %v639_v13  ;;  %v632_v37 = vld [vmem:[#allocation2 + $0x1e] sm:$0xff]  ;;  %v631_v38 = vld [vmem:[#allocation2 + $0x16] sm:$0xff] }
  0x34   : > { %2405 = vrot.lane.b32.xlu1 %v2404_v10, %s2585_s24  ;;  %s3158_s24 = sld [smem:[#allocation20_spill]] }
  0x3a   : > { %2400 = vrot.lane.b32.xlu0 %v2399_v15, %s3134_s27  ;;  %v2265_v50 = vld [vmem:[%s3158_s24 + $0x28] sm:$0xff]  ;;  %v2264_v53 = vld [vmem:[%s3158_s24 + $0x20] sm:$0xff]  ;;  %v2263_v55 = vld [vmem:[%s3158_s24 + $0x18] sm:$0xff] }
  0x3b   : > { %863 = vmatpush.bf16.msra.mxu1 %v2265_v50  ;;  %v2262_v15 = vld [vmem:[%s3158_s24 + $0x10] sm:$0xff]  ;;  %v2260_v19 = vld [vmem:[%s3158_s24] sm:$0xff] }
  0x3c   : > { %2410 = vrot.lane.b32.xlu1 %v2409_v16, %s3134_s27  ;;  %s3138_s27 = smov 64   ;;  %v2261_v16 = vld [vmem:[%s3158_s24 + $0x8] sm:$0xff] }
  0x3f   : > { %864 = vmatpush.bf16.msra.mxu1 %v2264_v53 }
  0x43   : > { %865 = vmatpush.bf16.msra.mxu1 %v2263_v55 }
  0x47   : > { %866 = vmatpush.bf16.msra.mxu1 %v2262_v15 }
  0x4b   : > { %867 = vmatpush.bf16.msra.mxu1 %v2261_v16 }
  0x4f   : > { %868 = vmatpush.bf16.msra.mxu1 %v2260_v19 }
  0xa4   : > { %v2396_v20 = vpop.permute.xlu0 %2395 }
  0xa5   : > { %v2398_v21 = vunpack.i.h.bf16 %v2396_v20  ;;  %v2397_v22 = vunpack.i.l.bf16 %v2396_v20  ;;  %v885_v20 = vpack.c.bf16 %v2764_v4, %v2760_v3 }
  0xa6   : > { %v2406_v26 = vpop.permute.xlu1 %2405 }
  0xa7   : > { %v673_v29 = vsel %vm623_vm0, %v629_v23, %v2397_v22  ;;  %v674_v30 = vsel %vm623_vm0, %v630_v24, %v2398_v21  ;;  %v2408_v34 = vunpack.i.h.bf16 %v2406_v26  ;;  %v2407_v35 = vunpack.i.l.bf16 %v2406_v26  ;;  %2000 = vmatmul.msk.bf16.gmra.mxu2 %vm623_vm0, %v885_v20 }
  0xa9   : > { %v676_v41 = vsel %vm623_vm0, %v632_v37, %v2408_v34  ;;  %v675_v42 = vsel %vm623_vm0, %v631_v38, %v2407_v35 }
  0xac   : > { %v2401_v25 = vpop.permute.xlu0 %2400 }
  0xad   : > { %v2403_v27 = vunpack.i.h.bf16 %v2401_v25  ;;  %v2402_v28 = vunpack.i.l.bf16 %v2401_v25 }
  0xae   : > { %v2411_v36 = vpop.permute.xlu1 %2410 }
  0xaf   : > { %v678_v31 = vsel %vm677_vm1, %v673_v29, %v2402_v28  ;;  %v679_v32 = vsel %vm677_vm1, %v674_v30, %v2403_v27  ;;  %v2413_v39 = vunpack.i.h.bf16 %v2411_v36  ;;  %v2412_v40 = vunpack.i.l.bf16 %v2411_v36 }
  0xb0   : > { %v682_v33 = vpack.c.bf16 %v679_v32, %v678_v31 }
  0xb1   : > { %v680_v43 = vsel %vm677_vm1, %v675_v42, %v2412_v40  ;;  %v681_v44 = vsel %vm677_vm1, %v676_v41, %v2413_v39 }
  0xb2   : > { %1967 = vmatmul.msk.bf16.vlgmr.msra.gmra.mxu0 %vm712_vm2, %v682_v33  ;;  %v683_v45 = vpack.c.bf16 %v681_v44, %v680_v43  ;;  %v2286_v43 = vld [vmem:[%s3123_s11 + $0x8] sm:$0xff]  ;;  %v2285_v44 = vld [vmem:[%s3123_s11] sm:$0xff] }
  0xb3   : > { %1294 = vmatpush.bf16.msrb.mxu1 %v2286_v43 }
  0xb7   : > { %1295 = vmatpush.bf16.msrb.mxu1 %v2285_v44 }
  0xc2   : > { %1968 = vmatmul.msk.bf16.gmra.mxu0 %vm712_vm2, %v683_v45  ;;  %v913_v45 = vpop.f32.mrf.mxu2 }
  0xca   : > { %v915_v53 = vpop.f32.mrf.mxu2 }
 0x12f   : > { %v728_v47 = vpop.f32.mrf.mxu0 }
 0x130   : > { %v729_v48 = vadd.f32 %v2474_v46, %v728_v47  ;;  %v2476_v47 = vld [vmem:[%s3118_s6] ss:$0 sm:$0xff] }
 0x131   : > { %v914_v50 = vadd.f32 %v2476_v47, %v913_v45 }
 0x132   : > { %v738_v49 = vmax.f32 %v729_v48, 0.0 }
 0x134   : > { %743 = vst.msk [vmem:[#allocation3 + $0x8] sm:$0xff] %vm677_vm1, %v738_v49 }
 0x137   : > { %v730_v51 = vpop.f32.mrf.mxu0 }
 0x138   : > { %v731_v52 = vadd.f32 %v2474_v46, %v730_v51 }
 0x13a   : > { %v739_v54 = vmax.f32 %v731_v52, 0.0 }
 0x13b   : > { %v751_v59 = vld [vmem:[#allocation3 + $0x7] sm:$0xff] }
 0x13c   : > { %744 = vst.msk [vmem:[#allocation3 + $0x10] sm:$0xff] %vm677_vm1, %v739_v54  ;;  %v755_v7 = vld [vmem:[#allocation3 + $0x8] sm:$0xff] }
 0x13d   : > { %v747_v23 = vld [vmem:[#allocation3 + $0x6] sm:$0xff] }
 0x13f   : > { %v733_v56 = vpop.f32.mrf.mxu0 }
 0x140   : > { %v734_v57 = vadd.f32 %v2474_v46, %v733_v56 }
 0x142   : > { %v740_v58 = vmax.f32 %v734_v57, 0.0  ;;  %v916_v57 = vadd.f32 %v2476_v47, %v915_v53 }
 0x143   : > { %v752_v60 = vld [vmem:[#allocation3 + $0xf] sm:$0xff] }
 0x144   : > { %745 = vst.msk [vmem:[#allocation3 + $0x18] sm:$0xff] %vm677_vm1, %v740_v58  ;;  %v2414_v61 = vpack.i.bf16 %v752_v60, %v751_v59  ;;  %v756_v5 = vld [vmem:[#allocation3 + $0x10] sm:$0xff] }
 0x145   : > { %v2419_v8 = vpack.i.bf16 %v756_v5, %v755_v7  ;;  %v748_v24 = vld [vmem:[#allocation3 + $0xe] sm:$0xff] }
 0x146   : > { %2415 = vrot.lane.b32.xlu2 %v2414_v61, %s3159_s25 }
 0x147   : > { %v735_v62 = vpop.f32.mrf.mxu0 }
 0x148   : > { %v736_v63 = vadd.f32 %v2474_v46, %v735_v62  ;;  %v2475_v46 = vld [vmem:[%s3161_s4] ss:$0 sm:$0xff]  ;;  %s2533_s4 = scalar_lea.hbm %s3131_s19, 64 }
 0x14a   : > { %v741_v6 = vmax.f32 %v736_v63, 0.0 }
 0x14b   : > { %v757_v9 = vld [vmem:[#allocation3 + $0x18] sm:$0xff] }
 0x14c   : > { %746 = vst.msk [vmem:[#allocation3 + $0x20] sm:$0xff] %vm677_vm1, %v741_v6  ;;  %v753_v11 = vld [vmem:[#allocation3 + $0x17] sm:$0xff] }
 0x14d   : > { %v749_v37 = vld [vmem:[#allocation3 + $0x16] sm:$0xff] }
 0x14e   : > { %2420 = vrot.lane.b32.xlu2 %v2419_v8, %s3138_s27 }
 0x153   : > { %v758_v10 = vld [vmem:[#allocation3 + $0x20] sm:$0xff] }
 0x154   : > { %v754_v12 = vld [vmem:[#allocation3 + $0x1f] sm:$0xff]  ;;  %v2429_v13 = vpack.i.bf16 %v758_v10, %v757_v9  ;;  %v918_v9 = vpop.f32.mrf.mxu2 }
 0x155   : > { %v2424_v14 = vpack.i.bf16 %v754_v12, %v753_v11  ;;  %v750_v36 = vld [vmem:[#allocation3 + $0x1e] sm:$0xff]  ;;  %v919_v11 = vadd.f32 %v2476_v47, %v918_v9  ;;  %v2280_v9 = vld [vmem:[%s3121_s9 + $0x38] sm:$0xff] }
 0x156   : > { %2430 = vrot.lane.b32.xlu1 %v2429_v13, %s3138_s27  ;;  %1218 = vmatpush.bf16.msrb.mxu0 %v2280_v9  ;;  %s2327_s27 = sshll.u32 %s2711_s1, 5 }
 0x157   : > { %2425 = vrot.lane.b32.xlu0 %v2424_v14, %s3159_s25  ;;  %2328 = vmatpush.bf16.msrb.mxu2 %v2280_v9  ;;  %s1868_s29 = scalar_lea.hbm %s3131_s19, %s2327_s27 }
 0x158   : > { %s1871_s23 = sshll.u32 %s1868_s29, 4  ;;  %s1872_s23 = int_to_ptr.hbm [resolvable:$true] %s1871_s23 }
 0x159   : > { %s2527_s13 = sshra.s32 %s1872_s23, 4  ;;  %s2528_s13 = int_to_ptr.hbm [resolvable:$true] %s2527_s13 }
 0x15a   : > { %s2529_s28 = scalar_lea.hbm %s2528_s13, 32  ;;  %p2534_p3 = scmp.lt.s32.totalorder %s2528_s13, %s3131_s19 }
 0x15b   : > { %p2530_p0 = scmp.ne.s32.totalorder %s2528_s13, %s2529_s28  ;;  %p2535_p4 = scmp.lt.s32.totalorder %s2533_s4, %s2529_s28 }
 0x15c   : > { %v920_v16 = vpop.f32.mrf.mxu2 }
 0x15d   : > { %v921_v19 = vadd.f32 %v2476_v47, %v920_v16  ;;  %v2276_v16 = vld [vmem:[%s3121_s9 + $0x18] sm:$0xff]  ;;  %p2531_p1 = pnand %p2530_p0, %p2728_p5  ;;  %p2536_p7 = por %p2535_p4, %p2534_p3 }
 0x15f   : > { %p2532_p2 = pneg %p2531_p1 }
 0x161   : > { %p2537_p8 = pnand %p2536_p7, %p2532_p2 }
 0x1a0   : > { %v2416_v1 = vpop.permute.xlu2 %2415 }
 0x1a1   : > { %v2418_v2 = vunpack.i.h.bf16 %v2416_v1  ;;  %v2417_v21 = vunpack.i.l.bf16 %v2416_v1 }
 0x1a3   : > { %v791_v27 = vsel %vm677_vm1, %v747_v23, %v2417_v21  ;;  %v792_v28 = vsel %vm677_vm1, %v748_v24, %v2418_v2 }
 0x1a8   : > { %v2421_v22 = vpop.permute.xlu2 %2420 }
 0x1a9   : > { %v2423_v25 = vunpack.i.h.bf16 %v2421_v22  ;;  %v2422_v26 = vunpack.i.l.bf16 %v2421_v22 }
 0x1ab   : > { %v796_v29 = vsel %vm795_vm3, %v791_v27, %v2422_v26  ;;  %v797_v30 = vsel %vm795_vm3, %v792_v28, %v2423_v25  ;;  %v2272_v28 = vld [vmem:[%s3119_s7 + $0x28] sm:$0xff] }
 0x1ac   : > { %v800_v3 = vpack.c.bf16 %v797_v30, %v796_v29  ;;  %1050 = vmatpush.bf16.msra.mxu3 %v2272_v28  ;;  %v2271_v29 = vld [vmem:[%s3119_s7 + $0x20] sm:$0xff]  ;;  %v2270_v30 = vld [vmem:[%s3119_s7 + $0x18] sm:$0xff] }
 0x1ae   : > { %1993 = vmatmul.msk.bf16.vlgmr.msra.gmra.mxu1 %vm854_vm4, %v800_v3  ;;  %v2269_v3 = vld [vmem:[%s3119_s7 + $0x10] sm:$0xff] }
 0x1b0   : > { %1051 = vmatpush.bf16.msra.mxu3 %v2271_v29 }
 0x1b4   : > { %1052 = vmatpush.bf16.msra.mxu3 %v2270_v30 }
 0x1b8   : > { %1053 = vmatpush.bf16.msra.mxu3 %v2269_v3 }
 0x1c8   : > { %v2431_v4 = vpop.permute.xlu1 %2430 }
 0x1c9   : > { %v2426_v31 = vpop.permute.xlu0 %2425  ;;  %v2433_v32 = vunpack.i.h.bf16 %v2431_v4  ;;  %v2432_v33 = vunpack.i.l.bf16 %v2431_v4  ;;  %v2268_v4 = vld [vmem:[%s3119_s7 + $0x8] sm:$0xff] }
 0x1ca   : > { %v2428_v34 = vunpack.i.h.bf16 %v2426_v31  ;;  %v2427_v35 = vunpack.i.l.bf16 %v2426_v31  ;;  %1054 = vmatpush.bf16.msra.mxu3 %v2268_v4  ;;  %v2267_v31 = vld [vmem:[%s3119_s7] sm:$0xff] }
 0x1cc   : > { %v794_v38 = vsel %vm677_vm1, %v750_v36, %v2428_v34  ;;  %v793_v39 = vsel %vm677_vm1, %v749_v37, %v2427_v35 }
 0x1cd   : > { %v798_v40 = vsel %vm795_vm3, %v793_v39, %v2432_v33  ;;  %v799_v41 = vsel %vm795_vm3, %v794_v38, %v2433_v32 }
 0x1ce   : > { %v801_v42 = vpack.c.bf16 %v799_v41, %v798_v40  ;;  %1055 = vmatpush.bf16.msra.mxu3 %v2267_v31 }
 0x1d0   : > { %1994 = vmatmul.msk.bf16.gmra.mxu1 %vm854_vm4, %v801_v42 }
 0x22b   : > { %v870_v48 = vpop.f32.mrf.mxu1 }
 0x22c   : > { %v871_v49 = vadd.f32 %v2475_v46, %v870_v48 }
 0x22e   : > { %v880_v51 = vmax.f32 %v871_v49, 0.0 }
 0x230   : > { %v923_v52 = vadd.f32 %v914_v50, %v880_v51 }
 0x232   : > { %v927_v54 = vmax.f32 %v923_v52, 0.0 }
 0x233   : > { %v872_v55 = vpop.f32.mrf.mxu1 }
 0x234   : > { %932 = vst.msk [vmem:[#allocation4 + $0x8] sm:$0xff] %vm677_vm1, %v927_v54  ;;  %v873_v56 = vadd.f32 %v2475_v46, %v872_v55 }
 0x236   : > { %v881_v58 = vmax.f32 %v873_v56, 0.0 }
 0x238   : > { %v924_v59 = vadd.f32 %v916_v57, %v881_v58  ;;  %v2478_v58 = vld [vmem:[%s3120_s8] ss:$0 sm:$0xff] }
 0x23a   : > { %v928_v60 = vmax.f32 %v924_v59, 0.0 }
 0x23b   : > { %v944_v62 = vld [vmem:[#allocation4 + $0x8] sm:$0xff] }
 0x23c   : > { %933 = vst.msk [vmem:[#allocation4 + $0x10] sm:$0xff] %vm677_vm1, %v928_v60  ;;  %v1260_v61 = vpack.c.bf16 %v928_v60, %v927_v54  ;;  %v940_v5 = vld [vmem:[#allocation4 + $0x6] sm:$0xff] }
 0x23d   : > { %v936_v36 = vld [vmem:[#allocation4 + $0x4] sm:$0xff] }
 0x23e   : > { %2085 = vmatmul.msk.bf16.vlgmr.msrb.gmra.mxu1 %vm677_vm1, %v1260_v61 }
 0x243   : > { %v945_v63 = vld [vmem:[#allocation4 + $0x10] sm:$0xff] }
 0x244   : > { %v941_v6 = vld [vmem:[#allocation4 + $0xe] sm:$0xff]  ;;  %v2439_v7 = vpack.i.bf16 %v945_v63, %v944_v62 }
 0x245   : > { %v2434_v8 = vpack.i.bf16 %v941_v6, %v940_v5  ;;  %v937_v37 = vld [vmem:[#allocation4 + $0xc] sm:$0xff] }
 0x246   : > { %2440 = vrot.lane.b32.xlu0 %v2439_v7, %s3162_s20 }
 0x247   : > { %2435 = vrot.lane.b32.xlu2 %v2434_v8, %s3159_s25 }
 0x24d   : > { %v875_v10 = vpop.f32.mrf.mxu1 }
 0x24e   : > { %v876_v12 = vadd.f32 %v2475_v46, %v875_v10  ;;  %v2279_v10 = vld [vmem:[%s3121_s9 + $0x30] sm:$0xff] }
 0x24f   : > { %1219 = vmatpush.bf16.msrb.mxu0 %v2279_v10  ;;  %2329 = vmatpush.bf16.msrb.mxu2 %v2279_v10 }
 0x250   : > { %v882_v13 = vmax.f32 %v876_v12, 0.0 }
 0x252   : > { %v925_v14 = vadd.f32 %v919_v11, %v882_v13  ;;  %v2278_v11 = vld [vmem:[%s3121_s9 + $0x28] sm:$0xff] }
 0x253   : > { %1220 = vmatpush.bf16.msrb.mxu0 %v2278_v11  ;;  %2330 = vmatpush.bf16.msrb.mxu2 %v2278_v11 }
 0x254   : > { %v929_v15 = vmax.f32 %v925_v14, 0.0  ;;  %v2277_v14 = vld [vmem:[%s3121_s9 + $0x20] sm:$0xff] }
 0x255   : > { %v877_v17 = vpop.f32.mrf.mxu1 }
 0x256   : > { %934 = vst.msk [vmem:[#allocation4 + $0x18] sm:$0xff] %vm677_vm1, %v929_v15  ;;  %v878_v18 = vadd.f32 %v2475_v46, %v877_v17 }
 0x257   : > { %1221 = vmatpush.bf16.msrb.mxu0 %v2277_v14  ;;  %2331 = vmatpush.bf16.msrb.mxu2 %v2277_v14  ;;  %v2325_v14 = vld [vmem:[%s3129_s17 + $0x10] sm:$0xff] }
 0x258   : > { %v883_v20 = vmax.f32 %v878_v18, 0.0 }
 0x25a   : > { %v926_v1 = vadd.f32 %v921_v19, %v883_v20  ;;  %v2275_v19 = vld [vmem:[%s3121_s9 + $0x10] sm:$0xff] }
 0x25b   : > { %1222 = vmatpush.bf16.msrb.mxu0 %v2276_v16  ;;  %2332 = vmatpush.bf16.msrb.mxu2 %v2276_v16 }
 0x25c   : > { %v930_v2 = vmax.f32 %v926_v1, 0.0  ;;  %v2274_v1 = vld [vmem:[%s3121_s9 + $0x8] sm:$0xff] }
 0x25d   : > { %v942_v22 = vld [vmem:[#allocation4 + $0x16] sm:$0xff] }
 0x25e   : > { %935 = vst.msk [vmem:[#allocation4 + $0x20] sm:$0xff] %vm677_vm1, %v930_v2  ;;  %v1261_v21 = vpack.c.bf16 %v930_v2, %v929_v15  ;;  %v946_v24 = vld [vmem:[#allocation4 + $0x18] sm:$0xff] }
 0x25f   : > { %v938_v52 = vld [vmem:[#allocation4 + $0x14] sm:$0xff]  ;;  %1223 = vmatpush.bf16.msrb.mxu0 %v2275_v19  ;;  %2333 = vmatpush.bf16.msrb.mxu2 %v2275_v19 }
 0x260   : > { %2086 = vmatmul.msk.bf16.gmra.mxu1 %vm677_vm1, %v1261_v21 }
 0x263   : > { %1224 = vmatpush.bf16.msrb.mxu0 %v2274_v1  ;;  %2334 = vmatpush.bf16.msrb.mxu2 %v2274_v1 }
 0x265   : > { %v943_v23 = vld [vmem:[#allocation4 + $0x1e] sm:$0xff] }
 0x266   : > { %v947_v25 = vld [vmem:[#allocation4 + $0x20] sm:$0xff]  ;;  %v2444_v26 = vpack.i.bf16 %v943_v23, %v942_v22  ;;  %v2273_v23 = vld [vmem:[%s3121_s9] sm:$0xff] }
 0x267   : > { %v2449_v27 = vpack.i.bf16 %v947_v25, %v946_v24  ;;  %v939_v51 = vld [vmem:[#allocation4 + $0x1c] sm:$0xff]  ;;  %1225 = vmatpush.bf16.msrb.mxu0 %v2273_v23  ;;  %2335 = vmatpush.bf16.msrb.mxu2 %v2273_v23  ;;  %v2284_v24 = vld [vmem:[%s3121_s9 + $0x58] sm:$0xff] }
 0x268   : > { %2445 = vrot.lane.b32.xlu1 %v2444_v26, %s3159_s25  ;;  %v2283_v25 = vld [vmem:[%s3121_s9 + $0x50] sm:$0xff]  ;;  %v2282_v26 = vld [vmem:[%s3121_s9 + $0x48] sm:$0xff]  ;;  %s610_s25 = sand.u32 1, %s2571_s30  }
 0x269   : > { %2450 = vrot.lane.b32.xlu2 %v2449_v27, %s3162_s20  ;;  %v2281_v27 = vld [vmem:[%s3121_s9 + $0x40] sm:$0xff]  ;;  %v2324_v23 = vld [vmem:[%s3129_s17 + $0x8] sm:$0xff]  ;;  %s1857_s1 = scalar_lea.sflag [#allocation10], %s610_s25 }
 0x26b   : > { %1241 = vmatpush.bf16.msra.mxu0 %v2284_v24 }
 0x26f   : > { %1242 = vmatpush.bf16.msra.mxu0 %v2283_v25 }
 0x273   : > { %1243 = vmatpush.bf16.msra.mxu0 %v2282_v26 }
 0x277   : > { %1244 = vmatpush.bf16.msra.mxu0 %v2281_v27  ;;  %v2323_v27 = vld [vmem:[%s3129_s17] sm:$0xff] }
 0x2a1   : > { %v2436_v32 = vpop.permute.xlu2 %2435 }
 0x2a2   : > { %v2438_v33 = vunpack.i.h.bf16 %v2436_v32  ;;  %v2437_v34 = vunpack.i.l.bf16 %v2436_v32 }
 0x2a4   : > { %v980_v40 = vsel %vm677_vm1, %v936_v36, %v2437_v34  ;;  %v981_v41 = vsel %vm677_vm1, %v937_v37, %v2438_v33 }
 0x2b8   : > { %v2441_v35 = vpop.permute.xlu0 %2440 }
 0x2b9   : > { %v2443_v38 = vunpack.i.h.bf16 %v2441_v35  ;;  %v2442_v39 = vunpack.i.l.bf16 %v2441_v35 }
 0x2bb   : > { %v984_v42 = vsel %vm795_vm3, %v980_v40, %v2442_v39  ;;  %v985_v43 = vsel %vm795_vm3, %v981_v41, %v2443_v38 }
 0x2bc   : > { %v988_v44 = vpack.c.bf16 %v985_v43, %v984_v42 }
 0x2be   : > { %2025 = vmatmul.msk.bf16.vlgmr.msra.gmra.mxu3 %vm854_vm4, %v988_v44 }
 0x2c3   : > { %v2451_v45 = vpop.permute.xlu2 %2450 }
 0x2c4   : > { %v2453_v49 = vunpack.i.h.bf16 %v2451_v45  ;;  %v2452_v50 = vunpack.i.l.bf16 %v2451_v45 }
 0x2da   : > { %v2446_v46 = vpop.permute.xlu1 %2445 }
 0x2db   : > { %v2448_v47 = vunpack.i.h.bf16 %v2446_v46  ;;  %v2447_v48 = vunpack.i.l.bf16 %v2446_v46 }
 0x2dd   : > { %v983_v53 = vsel %vm677_vm1, %v939_v51, %v2448_v47  ;;  %v982_v54 = vsel %vm677_vm1, %v938_v52, %v2447_v48  ;;  %v2298_v48 = vld [vmem:[#allocation8 + $0x58] sm:$0xff]  ;;  %v2296_v51 = vld [vmem:[#allocation8 + $0x48] sm:$0xff]  ;;  %v2295_v52 = vld [vmem:[#allocation8 + $0x40] sm:$0xff] }
 0x2de   : > { %v986_v55 = vsel %vm795_vm3, %v982_v54, %v2452_v50  ;;  %v987_v56 = vsel %vm795_vm3, %v983_v53, %v2453_v49  ;;  %1482 = vmatpush.bf16.msra.mxu2 %v2298_v48  ;;  %v2297_v49 = vld [vmem:[#allocation8 + $0x50] sm:$0xff]  ;;  %v2290_v48 = vld [vmem:[#allocation8 + $0x18] sm:$0xff] }
 0x2df   : > { %v989_v57 = vpack.c.bf16 %v987_v56, %v986_v55  ;;  %v2479_v54 = vld [vmem:[%s3122_s10] ss:$0 sm:$0xff]  ;;  %v1297_v55 = vpop.f32.mrf.mxu1 }
 0x2e0   : > { %v2477_v56 = vld [vmem:[%s3124_s12] ss:$0 sm:$0xff] }
 0x2e1   : > { %2026 = vmatmul.msk.bf16.gmra.mxu3 %vm854_vm4, %v989_v57 }
 0x2e2   : > { %1483 = vmatpush.bf16.msra.mxu2 %v2297_v49  ;;  %v2289_v49 = vld [vmem:[#allocation8 + $0x10] sm:$0xff] }
 0x2e6   : > { %1484 = vmatpush.bf16.msra.mxu2 %v2296_v51 }
 0x2ea   : > { %1485 = vmatpush.bf16.msra.mxu2 %v2295_v52  ;;  %v2287_v52 = vld [vmem:[#allocation8] sm:$0xff] }
 0x341   : > { %v1057_v59 = vpop.f32.mrf.mxu3 }
 0x342   : > { %v1058_v60 = vadd.f32 %v2478_v58, %v1057_v59 }
 0x344   : > { %v1067_v61 = vmax.f32 %v1058_v60, 0.0  ;;  %v1298_v60 = vadd.f32 %v2477_v56, %v1297_v55 }
 0x346   : > { %1072 = vst.msk [vmem:[#allocation5 + $0x8] sm:$0xff] %vm795_vm3, %v1067_v61 }
 0x349   : > { %v1059_v62 = vpop.f32.mrf.mxu3 }
 0x34a   : > { %v1060_v63 = vadd.f32 %v2478_v58, %v1059_v62 }
 0x34c   : > { %v1068_v5 = vmax.f32 %v1060_v63, 0.0 }
 0x34d   : > { %v1080_v6 = vld [vmem:[#allocation5 + $0x6] sm:$0xff] }
 0x34e   : > { %1073 = vst.msk [vmem:[#allocation5 + $0x10] sm:$0xff] %vm795_vm3, %v1068_v5  ;;  %v1076_v3 = vld [vmem:[#allocation5 + $0x4] sm:$0xff] }
 0x34f   : > { %v1084_v35 = vld [vmem:[#allocation5 + $0x8] sm:$0xff] }
 0x355   : > { %v1081_v7 = vld [vmem:[#allocation5 + $0xe] sm:$0xff] }
 0x356   : > { %v2454_v8 = vpack.i.bf16 %v1081_v7, %v1080_v6  ;;  %v1077_v4 = vld [vmem:[#allocation5 + $0xc] sm:$0xff]  ;;  %v1299_v6 = vpop.f32.mrf.mxu1 }
 0x357   : > { %v1085_v34 = vld [vmem:[#allocation5 + $0x10] sm:$0xff]  ;;  %v1300_v9 = vadd.f32 %v2477_v56, %v1299_v6 }
 0x358   : > { %2455 = vrot.lane.b32.xlu0 %v2454_v8, %s3162_s20  ;;  %v1109_v36 = vpack.c.bf16 %v1085_v34, %v1084_v35 }
 0x364   : > { %v1062_v12 = vpop.f32.mrf.mxu3 }
 0x365   : > { %v1063_v13 = vadd.f32 %v2478_v58, %v1062_v12 }
 0x367   : > { %v1069_v15 = vmax.f32 %v1063_v13, 0.0  ;;  %v2326_v13 = vld [vmem:[%s3129_s17 + $0x18] sm:$0xff] }
 0x369   : > { %1074 = vst.msk [vmem:[#allocation5 + $0x18] sm:$0xff] %vm795_vm3, %v1069_v15  ;;  %v1302_v15 = vpop.f32.mrf.mxu1 }
 0x36a   : > { %v1303_v25 = vadd.f32 %v2477_v56, %v1302_v15  ;;  %v2302_v15 = vld [vmem:[%s3127_s15 + $0x18] sm:$0xff] }
 0x36c   : > { %v1064_v17 = vpop.f32.mrf.mxu3 }
 0x36d   : > { %v1065_v18 = vadd.f32 %v2478_v58, %v1064_v17 }
 0x36f   : > { %v1070_v20 = vmax.f32 %v1065_v18, 0.0 }
 0x370   : > { %v1082_v2 = vld [vmem:[#allocation5 + $0x16] sm:$0xff] }
 0x371   : > { %1075 = vst.msk [vmem:[#allocation5 + $0x20] sm:$0xff] %vm795_vm3, %v1070_v20  ;;  %v1086_v41 = vld [vmem:[#allocation5 + $0x18] sm:$0xff] }
 0x372   : > { %v1078_v43 = vld [vmem:[#allocation5 + $0x14] sm:$0xff] }
 0x378   : > { %v1083_v21 = vld [vmem:[#allocation5 + $0x1e] sm:$0xff] }
 0x379   : > { %v2459_v22 = vpack.i.bf16 %v1083_v21, %v1082_v2  ;;  %v1087_v37 = vld [vmem:[#allocation5 + $0x20] sm:$0xff] }
 0x37a   : > { %v1111_v42 = vpack.c.bf16 %v1087_v37, %v1086_v41  ;;  %v1079_v44 = vld [vmem:[#allocation5 + $0x1c] sm:$0xff] }
 0x37b   : > { %2460 = vrot.lane.b32.xlu1 %v2459_v22, %s3162_s20 }
 0x3ca   : > { %v2456_v28 = vpop.permute.xlu0 %2455 }
 0x3cb   : > { %v2458_v29 = vunpack.i.h.bf16 %v2456_v28  ;;  %v2457_v30 = vunpack.i.l.bf16 %v2456_v28 }
 0x3cd   : > { %v1104_v31 = vsel %vm795_vm3, %v1076_v3, %v2457_v30  ;;  %v1105_v32 = vsel %vm795_vm3, %v1077_v4, %v2458_v29  ;;  %v1304_v4 = vpop.f32.mrf.mxu1 }
 0x3ce   : > { %v1108_v33 = vpack.c.bf16 %v1105_v32, %v1104_v31 }
 0x3d0   : > { %1226 = vmatmul.bf16.vlgmr.msrb.gmra.mxu0 %v1108_v33  ;;  %v1305_v33 = vadd.f32 %v2477_v56, %v1304_v4 }
 0x3e0   : > { %2075 = vmatmul.msk.bf16.vlgmr.msra.gmra.mxu0 %vm795_vm3, %v1109_v36 }
 0x3ed   : > { %v2461_v38 = vpop.permute.xlu1 %2460 }
 0x3ee   : > { %v2463_v39 = vunpack.i.h.bf16 %v2461_v38  ;;  %v2462_v40 = vunpack.i.l.bf16 %v2461_v38 }
 0x3f0   : > { %v1106_v45 = vsel %vm795_vm3, %v1078_v43, %v2462_v40  ;;  %v1107_v46 = vsel %vm795_vm3, %v1079_v44, %v2463_v39  ;;  %2076 = vmatmul.msk.bf16.gmra.mxu0 %vm795_vm3, %v1111_v42  ;;  %v2294_v43 = vld [vmem:[#allocation8 + $0x38] sm:$0xff]  ;;  %v2293_v44 = vld [vmem:[#allocation8 + $0x30] sm:$0xff] }
 0x3f1   : > { %v1110_v47 = vpack.c.bf16 %v1107_v46, %v1106_v45  ;;  %1459 = vmatpush.bf16.msrb.mxu3 %v2294_v43  ;;  %v2292_v45 = vld [vmem:[#allocation8 + $0x28] sm:$0xff]  ;;  %v2291_v46 = vld [vmem:[#allocation8 + $0x20] sm:$0xff] }
 0x3f3   : > { %1231 = vmatmul.bf16.vlgmr.msrb.gmra.mxu2 %v1110_v47 }
 0x3f4   : > { %1829 = vmatpush.bf16.msrb.mxu2 %v2326_v13  ;;  %v2304_v13 = vld [vmem:[%s3127_s15 + $0x28] sm:$0xff] }
 0x3f5   : > { %1460 = vmatpush.bf16.msrb.mxu3 %v2293_v44 }
 0x3f8   : > { %1830 = vmatpush.bf16.msrb.mxu2 %v2325_v14  ;;  %v2303_v14 = vld [vmem:[%s3127_s15 + $0x20] sm:$0xff] }
 0x3f9   : > { %1461 = vmatpush.bf16.msrb.mxu3 %v2292_v45 }
 0x3fc   : > { %1831 = vmatpush.bf16.msrb.mxu2 %v2324_v23  ;;  %v2310_v23 = vld [vmem:[%s3127_s15 + $0x58] sm:$0xff] }
 0x3fd   : > { %1462 = vmatpush.bf16.msrb.mxu3 %v2291_v46 }
 0x400   : > { %1832 = vmatpush.bf16.msrb.mxu2 %v2323_v27  ;;  %v2308_v27 = vld [vmem:[%s3127_s15 + $0x48] sm:$0xff] }
 0x401   : > { %1463 = vmatpush.bf16.msrb.mxu3 %v2290_v48 }
 0x405   : > { %1464 = vmatpush.bf16.msrb.mxu3 %v2289_v49 }
 0x44d   : > { %v1227_v50 = vpop.f32.mrf.mxu0 }
 0x44e   : > { %v1228_v57 = vadd.f32 %v2479_v54, %v1227_v50  ;;  %v2288_v50 = vld [vmem:[#allocation8 + $0x8] sm:$0xff] }
 0x44f   : > { %1465 = vmatpush.bf16.msrb.mxu3 %v2288_v50 }
 0x453   : > { %1466 = vmatpush.bf16.msrb.mxu3 %v2287_v52 }
 0x455   : > { %v1229_v53 = vpop.f32.mrf.mxu0 }
 0x456   : > { %v1230_v63 = vadd.f32 %v2479_v54, %v1229_v53 }
 0x45d   : > { %v1246_v58 = vpop.f32.mrf.mxu0 }
 0x45e   : > { %v1247_v59 = vadd.f32 %v1246_v58, %v1228_v57 }
 0x460   : > { %v1256_v61 = vmax.f32 %v1247_v59, 0.0 }
 0x462   : > { %v2954_v62 = vadd.f32 %v1298_v60, %v1256_v61 }
 0x464   : > { %v1311_v5 = vmax.f32 %v2954_v62, 0.0 }
 0x465   : > { %v1248_v7 = vpop.f32.mrf.mxu0 }
 0x466   : > { %1316 = vst.msk [vmem:[#allocation6 + $0x8] sm:$0xff] %vm795_vm3, %v1311_v5  ;;  %v1249_v8 = vadd.f32 %v1248_v7, %v1230_v63  ;;  %v2306_v7 = vld [vmem:[%s3127_s15 + $0x38] sm:$0xff] }
 0x467   : > { %1720 = vmatpush.bf16.msrb.mxu0 %v2306_v7 }
 0x468   : > { %v1257_v10 = vmax.f32 %v1249_v8, 0.0  ;;  %v2314_v8 = vld [vmem:[%s3127_s15 + $0x78] sm:$0xff] }
 0x469   : > { %1739 = vmatpush.bf16.msra.mxu1 %v2314_v8 }
 0x46a   : > { %v1308_v11 = vadd.f32 %v1300_v9, %v1257_v10  ;;  %v2322_v9 = vld [vmem:[%s3127_s15 + $0xb8] sm:$0xff]  ;;  %v2305_v10 = vld [vmem:[%s3127_s15 + $0x30] sm:$0xff] }
 0x46b   : > { %1758 = vmatpush.bf16.msra.mxu3 %v2322_v9  ;;  %1721 = vmatpush.bf16.msrb.mxu0 %v2305_v10 }
 0x46c   : > { %v1312_v12 = vmax.f32 %v1308_v11, 0.0  ;;  %v2313_v11 = vld [vmem:[%s3127_s15 + $0x70] sm:$0xff] }
 0x46d   : > { %v1324_v16 = vld [vmem:[#allocation6 + $0x4] sm:$0xff]  ;;  %v1251_v17 = vpop.f32.mrf.mxu0  ;;  %1740 = vmatpush.bf16.msra.mxu1 %v2313_v11 }
 0x46e   : > { %1317 = vst.msk [vmem:[#allocation6 + $0x10] sm:$0xff] %vm795_vm3, %v1312_v12  ;;  %v1321_v20 = vld [vmem:[#allocation6 + $0x8] sm:$0xff]  ;;  %v1781_v47 = vpack.c.bf16 %v1312_v12, %v1311_v5  ;;  %v2321_v12 = vld [vmem:[%s3127_s15 + $0xb0] sm:$0xff] }
 0x46f   : > { %1759 = vmatpush.bf16.msra.mxu3 %v2321_v12  ;;  %1722 = vmatpush.bf16.msrb.mxu0 %v2304_v13 }
 0x473   : > { %1723 = vmatpush.bf16.msrb.mxu0 %v2303_v14 }
 0x475   : > { %v1325_v19 = vld [vmem:[#allocation6 + $0xc] sm:$0xff]  ;;  %v1253_v31 = vpop.f32.mrf.mxu0 }
 0x476   : > { %v1232_v18 = vpop.f32.mrf.mxu2  ;;  %v2965_v1 = vld [vmem:[#allocation6 + $0x10] sm:$0xff]  ;;  %v2464_v21 = vpack.i.bf16 %v1325_v19, %v1324_v16  ;;  %v2320_v16 = vld [vmem:[%s3127_s15 + $0xa8] sm:$0xff] }
 0x477   : > { %v1233_v2 = vadd.f32 %v2479_v54, %v1232_v18  ;;  %v1350_v22 = vpack.c.bf16 %v2965_v1, %v1321_v20  ;;  %1724 = vmatpush.bf16.msrb.mxu0 %v2302_v15  ;;  %1760 = vmatpush.bf16.msra.mxu3 %v2320_v16  ;;  %v2319_v18 = vld [vmem:[%s3127_s15 + $0xa0] sm:$0xff]  ;;  %v2312_v19 = vld [vmem:[%s3127_s15 + $0x68] sm:$0xff] }
 0x478   : > { %2465 = vrot.lane.b32.xlu2 %v2464_v21, %s3162_s20  ;;  %1741 = vmatpush.bf16.msra.mxu1 %v2312_v19  ;;  %v2299_v21 = vld [vmem:[%s3127_s15] sm:$0xff] }
 0x479   : > { %v1252_v24 = vadd.f32 %v1251_v17, %v1233_v2  ;;  %2135 = vmatmul.msk.bf16.vlgmr.msra.gmra.mxu2 %vm795_vm3, %v1350_v22  ;;  %v2301_v17 = vld [vmem:[%s3127_s15 + $0x10] sm:$0xff]  ;;  %v2311_v2 = vld [vmem:[%s3127_s15 + $0x60] sm:$0xff] }
 0x47a   : > { %v2317_v22 = vld [vmem:[%s3127_s15 + $0x90] sm:$0xff] }
 0x47b   : > { %v1258_v26 = vmax.f32 %v1252_v24, 0.0  ;;  %1725 = vmatpush.bf16.msrb.mxu0 %v2301_v17  ;;  %1761 = vmatpush.bf16.msra.mxu3 %v2319_v18  ;;  %v2316_v24 = vld [vmem:[%s3127_s15 + $0x88] sm:$0xff] }
 0x47c   : > { %1742 = vmatpush.bf16.msra.mxu1 %v2311_v2 }
 0x47d   : > { %v1309_v28 = vadd.f32 %v1303_v25, %v1258_v26  ;;  %v2309_v25 = vld [vmem:[%s3127_s15 + $0x50] sm:$0xff]  ;;  %v2315_v26 = vld [vmem:[%s3127_s15 + $0x80] sm:$0xff] }
 0x47e   : > { %v1234_v29 = vpop.f32.mrf.mxu2 }
 0x47f   : > { %v1313_v30 = vmax.f32 %v1309_v28, 0.0  ;;  %v1235_v3 = vadd.f32 %v2479_v54, %v1234_v29  ;;  %v1320_v54 = vld [vmem:[#allocation6] sm:$0xff] }
 0x480   : > { %1743 = vmatpush.bf16.msra.mxu1 %v2310_v23  ;;  %v2307_v28 = vld [vmem:[%s3127_s15 + $0x40] sm:$0xff] }
 0x481   : > { %1318 = vst.msk [vmem:[#allocation6 + $0x18] sm:$0xff] %vm795_vm3, %v1313_v30  ;;  %v1254_v32 = vadd.f32 %v1253_v31, %v1235_v3  ;;  %v2481_v29 = vld [vmem:[%s3126_s14] ss:$0 sm:$0xff] }
 0x483   : > { %v1259_v34 = vmax.f32 %v1254_v32, 0.0 }
 0x484   : > { %1744 = vmatpush.bf16.msra.mxu1 %v2309_v25 }
 0x485   : > { %v1310_v35 = vadd.f32 %v1305_v33, %v1259_v34 }
 0x487   : > { %v1314_v36 = vmax.f32 %v1310_v35, 0.0 }
 0x488   : > { %v1326_v37 = vld [vmem:[#allocation6 + $0x14] sm:$0xff]  ;;  %1745 = vmatpush.bf16.msra.mxu1 %v2308_v27 }
 0x489   : > { %1319 = vst.msk [vmem:[#allocation6 + $0x20] sm:$0xff] %vm795_vm3, %v1314_v36  ;;  %v1323_v39 = vld [vmem:[#allocation6 + $0x18] sm:$0xff]  ;;  %v1782_v51 = vpack.c.bf16 %v1314_v36, %v1313_v30 }
 0x48c   : > { %1746 = vmatpush.bf16.msra.mxu1 %v2307_v28 }
 0x490   : > { %v1327_v38 = vld [vmem:[#allocation6 + $0x1c] sm:$0xff] }
 0x491   : > { %v1328_v40 = vld [vmem:[#allocation6 + $0x20] sm:$0xff]  ;;  %v2469_v41 = vpack.i.bf16 %v1327_v38, %v1326_v37 }
 0x492   : > { %v1352_v42 = vpack.c.bf16 %v1328_v40, %v1323_v39 }
 0x493   : > { %2470 = vrot.lane.b32.xlu0 %v2469_v41, %s3162_s20  ;;  %s1952_s20 = sshll.u32 %s610_s25, 5 }
 0x494   : > { %2136 = vmatmul.msk.bf16.gmra.mxu2 %vm795_vm3, %v1352_v42  ;;  %s3072_s2 = scalar_lea.vmem [#allocation11], %s1952_s20 }
 0x495   : > { %s1869_s22 = sshll.u32 %s3072_s2, 4  ;;  %s1870_s22 = int_to_ptr.vmem [resolvable:$true] %s1869_s22 }
 0x4a4   : > { %2249 = vmatmul.msk.bf16.vlgmr.msrb.gmra.mxu2 %vm795_vm3, %v1781_v47 }
 0x4b4   : > { %2250 = vmatmul.msk.bf16.gmra.mxu2 %vm795_vm3, %v1782_v51 }
 0x4d2   : > { %v2466_v53 = vpop.permute.xlu2 %2465 }
 0x4d3   : > { %v2468_v55 = vunpack.i.h.bf16 %v2466_v53  ;;  %v2467_v56 = vunpack.i.l.bf16 %v2466_v53 }
 0x4d5   : > { %v1345_v57 = vsel %vm795_vm3, %v1320_v54, %v2467_v56  ;;  %v1346_v58 = vsel %vm795_vm3, %v1321_v20, %v2468_v55  ;;  %v2300_v20 = vld [vmem:[%s3127_s15 + $0x8] sm:$0xff] }
 0x4d6   : > { %v1349_v59 = vpack.c.bf16 %v1346_v58, %v1345_v57  ;;  %1726 = vmatpush.bf16.msrb.mxu0 %v2300_v20  ;;  %v2482_v58 = vld [vmem:[%s3128_s16] ss:$0 sm:$0xff] }
 0x4d8   : > { %1467 = vmatmul.bf16.vlgmr.msrb.gmra.mxu3 %v1349_v59 }
 0x4da   : > { %1727 = vmatpush.bf16.msrb.mxu0 %v2299_v21 }
 0x4fc   : > { %v1487_v30 = vpop.f32.mrf.mxu2 }
 0x504   : > { %v1489_v36 = vpop.f32.mrf.mxu2 }
 0x505   : > { %v2471_v60 = vpop.permute.xlu0 %2470 }
 0x506   : > { %v2473_v61 = vunpack.i.h.bf16 %v2471_v60  ;;  %v2472_v62 = vunpack.i.l.bf16 %v2471_v60 }
 0x508   : > { %v1347_v63 = vsel %vm795_vm3, %v2965_v1, %v2472_v62  ;;  %v1348_v5 = vsel %vm795_vm3, %v1323_v39, %v2473_v61  ;;  %v2318_v1 = vld [vmem:[%s3127_s15 + $0x98] sm:$0xff] }
 0x509   : > { %v1351_v6 = vpack.c.bf16 %v1348_v5, %v1347_v63  ;;  %1762 = vmatpush.bf16.msra.mxu3 %v2318_v1  ;;  %v2480_v63 = vld [vmem:[%s3130_s18] ss:$0 sm:$0xff] }
 0x50b   : > { %1472 = vmatmul.bf16.gmra.mxu3 %v1351_v6 }
 0x50d   : > { %1763 = vmatpush.bf16.msra.mxu3 %v2317_v22 }
 0x511   : > { %1764 = vmatpush.bf16.msra.mxu3 %v2316_v24 }
 0x515   : > { %1765 = vmatpush.bf16.msra.mxu3 %v2315_v26 }
 0x517   : > { %v1492_v43 = vpop.f32.mrf.mxu2 }
 0x51f   : > { %v1494_v50 = vpop.f32.mrf.mxu2 }
 0x527   : > { %v1834_v59 = vpop.f32.mrf.mxu2 }
 0x528   : > { %v1835_v8 = vadd.f32 %v2480_v63, %v1834_v59 }
 0x52f   : > { %v1836_v15 = vpop.f32.mrf.mxu2 }
 0x530   : > { %v1837_v18 = vadd.f32 %v2480_v63, %v1836_v15 }
 0x537   : > { %v1839_v21 = vpop.f32.mrf.mxu2 }
 0x538   : > { %v1840_v28 = vadd.f32 %v2480_v63, %v1839_v21 }
 0x55b   : > { %v1468_v3 = vpop.f32.mrf.mxu3 }
 0x55c   : > { %v1469_v4 = vadd.f32 %v2481_v29, %v1468_v3 }
 0x55e   : > { %v1488_v31 = vadd.f32 %v1487_v30, %v1469_v4 }
 0x560   : > { %v1497_v32 = vmax.f32 %v1488_v31, 0.0 }
 0x562   : > { %1502 = vst [vmem:[#allocation7 + $0x8] sm:$0xff] %v1497_v32  ;;  %v1518_v33 = vpack.c.bf16 %v1497_v32, %v2584_v0 }
 0x563   : > { %v1470_v34 = vpop.f32.mrf.mxu3 }
 0x564   : > { %v1471_v35 = vadd.f32 %v2481_v29, %v1470_v34  ;;  %1728 = vmatmul.bf16.vlgmr.msrb.gmra.mxu0 %v1518_v33  ;;  %v1841_v33 = vpop.f32.mrf.mxu2 }
 0x566   : > { %v1490_v37 = vadd.f32 %v1489_v36, %v1471_v35  ;;  %v1842_v36 = vadd.f32 %v2480_v63, %v1841_v33 }
 0x568   : > { %v1498_v38 = vmax.f32 %v1490_v37, 0.0 }
 0x569   : > { %v1510_v40 = vld [vmem:[#allocation7 + $0x4] sm:$0xff] }
 0x56a   : > { %1503 = vst [vmem:[#allocation7 + $0x10] sm:$0xff] %v1498_v38  ;;  %v1520_v39 = vpack.c.bf16 %v1498_v38, %v1497_v32 }
 0x56c   : > { %1766 = vmatmul.bf16.vlgmr.msra.gmra.mxu3 %v1520_v39 }
 0x571   : > { %v1511_v41 = vld [vmem:[#allocation7 + $0xc] sm:$0xff] }
 0x572   : > { %v1519_v42 = vpack.c.bf16 %v1511_v41, %v1510_v40 }
 0x574   : > { %1747 = vmatmul.bf16.vlgmr.msra.gmra.mxu1 %v1519_v42 }
 0x58e   : > { %v1473_v44 = vpop.f32.mrf.mxu3 }
 0x58f   : > { %v1474_v45 = vadd.f32 %v2481_v29, %v1473_v44 }
 0x591   : > { %v1493_v46 = vadd.f32 %v1492_v43, %v1474_v45 }
 0x593   : > { %v1499_v47 = vmax.f32 %v1493_v46, 0.0 }
 0x595   : > { %1504 = vst [vmem:[#allocation7 + $0x18] sm:$0xff] %v1499_v47  ;;  %v1521_v0 = vpack.c.bf16 %v1499_v47, %v1498_v38 }
 0x596   : > { %v1475_v48 = vpop.f32.mrf.mxu3 }
 0x597   : > { %v1476_v49 = vadd.f32 %v2481_v29, %v1475_v48  ;;  %1733 = vmatmul.bf16.gmra.mxu0 %v1521_v0 }
 0x599   : > { %v1495_v51 = vadd.f32 %v1494_v50, %v1476_v49 }
 0x59b   : > { %v1500_v52 = vmax.f32 %v1495_v51, 0.0 }
 0x59c   : > { %v1512_v54 = vld [vmem:[#allocation7 + $0x14] sm:$0xff] }
 0x59d   : > { %1505 = vst [vmem:[#allocation7 + $0x20] sm:$0xff] %v1500_v52  ;;  %v1523_v53 = vpack.c.bf16 %v1500_v52, %v1499_v47 }
 0x59f   : > { %1771 = vmatmul.bf16.gmra.mxu3 %v1523_v53 }
 0x5a4   : > { %v1513_v55 = vld [vmem:[#allocation7 + $0x1c] sm:$0xff] }
 0x5a5   : > { %v1522_v56 = vpack.c.bf16 %v1513_v55, %v1512_v54 }
 0x5a7   : > { %1752 = vmatmul.bf16.gmra.mxu1 %v1522_v56 }
 0x5e1   : > { %v1729_v57 = vpop.f32.mrf.mxu0 }
 0x5e2   : > { %v1730_v60 = vadd.f32 %v2482_v58, %v1729_v57 }
 0x5e9   : > { %v1731_v7 = vpop.f32.mrf.mxu0 }
 0x5ea   : > { %v1732_v10 = vadd.f32 %v2482_v58, %v1731_v7 }
 0x5ef   : > { %v1767_v62 = vpop.f32.mrf.mxu3 }
 0x5f1   : > { %v1748_v61 = vpop.f32.mrf.mxu1 }
 0x5f2   : > { %v1749_v5 = vadd.f32 %v1748_v61, %v1730_v60 }
 0x5f4   : > { %v1768_v6 = vadd.f32 %v1767_v62, %v1749_v5 }
 0x5f6   : > { %v1777_v9 = vmax.f32 %v1768_v6, 0.0 }
 0x5f7   : > { %v1769_v16 = vpop.f32.mrf.mxu3 }
 0x5f8   : > { %v1844_v11 = vadd.f32 %v1835_v8, %v1777_v9 }
 0x5f9   : > { %v1750_v12 = vpop.f32.mrf.mxu1 }
 0x5fa   : > { %v1848_v13 = vmax.f32 %v1844_v11, 0.0  ;;  %v1751_v14 = vadd.f32 %v1750_v12, %v1732_v10 }
 0x5fc   : > { %1852 = vst [vmem:[%s3072_s2] sm:$0xff] %v1848_v13  ;;  %v1770_v17 = vadd.f32 %v1769_v16, %v1751_v14 }
 0x5fe   : > { %v1778_v19 = vmax.f32 %v1770_v17, 0.0 }
 0x600   : > { %v1845_v20 = vadd.f32 %v1837_v18, %v1778_v19 }
 0x602   : > { %v1849_v1 = vmax.f32 %v1845_v20, 0.0 }
 0x604   : > { %1853 = vst [vmem:[%s3072_s2 + $0x8] sm:$0xff] %v1849_v1 }
 0x614   : > { %v1734_v2 = vpop.f32.mrf.mxu0 }
 0x615   : > { %v1735_v22 = vadd.f32 %v2482_v58, %v1734_v2 }
 0x61c   : > { %v1736_v27 = vpop.f32.mrf.mxu0 }
 0x61d   : > { %v1737_v30 = vadd.f32 %v2482_v58, %v1736_v27 }
 0x622   : > { %v1772_v24 = vpop.f32.mrf.mxu3 }
 0x624   : > { %v1753_v23 = vpop.f32.mrf.mxu1 }
 0x625   : > { %v1754_v25 = vadd.f32 %v1753_v23, %v1735_v22 }
 0x627   : > { %v1773_v26 = vadd.f32 %v1772_v24, %v1754_v25 }
 0x629   : > { %v1779_v29 = vmax.f32 %v1773_v26, 0.0 }
 0x62a   : > { %v1774_v34 = vpop.f32.mrf.mxu3 }
 0x62b   : > { %v1846_v3 = vadd.f32 %v1840_v28, %v1779_v29 }
 0x62c   : > { %v1755_v4 = vpop.f32.mrf.mxu1 }
 0x62d   : > { %v1850_v31 = vmax.f32 %v1846_v3, 0.0  ;;  %v1756_v32 = vadd.f32 %v1755_v4, %v1737_v30 }
 0x62f   : > { %1854 = vst [vmem:[%s3072_s2 + $0x10] sm:$0xff] %v1850_v31  ;;  %v1775_v35 = vadd.f32 %v1774_v34, %v1756_v32 }
 0x631   : > { %v1780_v37 = vmax.f32 %v1775_v35, 0.0 }
 0x633   : > { %v1847_v38 = vadd.f32 %v1842_v36, %v1780_v37 }
 0x635   : > { %v1851_v39 = vmax.f32 %v1847_v38, 0.0 }
 0x637   : > { %1855 = vst [vmem:[%s3072_s2 + $0x18] sm:$0xff] %v1851_v39 }
 0x638   : > { %2540 = shalt.err (!%p2537_p8)
}
 0x639   : > { %s2588_s25 = smov 128   ;;  %s2589_s2 = smov 8  }
 0x63a   : > { %2340 = dma.vmem_to_hbm [thread:$0]  (%p2728_p5), %s1870_s22, 512, %s1872_s23, %s1857_s1, %s2588_s25, %s2588_s25, %s2589_s2  }
 0x63b PF: > { %p2352_p9 = scmp.ge.s32.totalorder %s2579_s21, 2  ;;  %s1886_s20 = sand.u32 1, %s2567_s0  }
 0x63c   : > { %s1887_s27 = scalar_lea.sflag [#allocation10], %s1886_s20 }
 0x63d   : > { %p2347_p10 = pnand %p2352_p9, %p2732_p6 }
 0x63f   : > { %p2348_p11 = pneg %p2347_p10 }
 0x641   : > { %2562 = dma.done.wait (%p2348_p11), %s1887_s27, 512  }
 0x642   : > { %2564 = vsyncadd (%p2348_p11), %s1887_s27, 4294966784  ;;  %s3163_s21 = sld [smem:[#allocation15_spill]]  ;;  %s3166_s0 = smov %s2571_s30 }
 0x643   : > { %s3164_s13 = sld [smem:[#allocation14_spill]] }
 0x644   : > { %s3165_s20 = sld [smem:[#allocation16_spill]] }
 0x648   : > { %p30_p12 = scmp.ge.s32.totalorder %s3163_s21, 4  }
 0x649   : > { %s3167_s30 = smov %s3164_s13 }
 0x64a   :  { %32 = sbr.rel (!%p30_p12) target bundleno = 12 (0xc), region = 136 }
 0x64f   :  { %1893 = vsyncpa [#allocation9], 1 }
 0x650   :  { %1895 = vsyncpa [#allocation9 + $0x1], 1 }
 0x651   :  { %1896 = vsyncpa [#allocation10], 1 }
 0x652   :  { %1898 = vsyncpa [#allocation10 + $0x1], 1 }

</bundles_post_ra>
